<compile_context>
chip_gen: v6e
topology: v6e:2x2x1
jax: 0.10.0
libtpu: 0.0.40
codegen_flags: <defaults>
</compile_context>

<pallas_src>
import functools

import jax
import jax.numpy as jnp
from jax.experimental import pallas as pl
from jax.experimental.pallas import tpu as pltpu

IN_FEATURES = 8 * 16      # 128
OUT_FEATURES = 256 * 16   # 4096


def _linear_kernel(x_ref, w_ref, b_ref, o_ref):
    # x_ref: [B, K]  f32 (VMEM-resident, constant index_map)
    # w_ref: [K, tn] bf16 (streamed column tile)
    # b_ref: [1, tn] f32  (streamed bias tile)
    # o_ref: [B, tn] f32
    acc = jnp.dot(
        x_ref[...].astype(jnp.bfloat16),
        w_ref[...],
        preferred_element_type=jnp.float32,
    )
    o_ref[...] = (acc + b_ref[...]).astype(o_ref.dtype)


def _default_tn():
    """Pick tile width by generation: grid=(2,) on dual-TC v7x, grid=(1,) otherwise."""
    try:
        kind = jax.devices()[0].device_kind.lower()
        if "v7" in kind:
            return 2048   # 2 tiles -> one per TensorCore
    except Exception:
        pass
    return 4096           # single TensorCore: one tile, fewest grid steps


@functools.partial(jax.jit, static_argnames=("tn",))
def _onehot16_forward_impl(x, w_t, b, *, tn):
    B, K = x.shape
    Kw, N = w_t.shape
    assert K == Kw == IN_FEATURES and N == OUT_FEATURES
    assert N % tn == 0 and tn % 128 == 0

    b2 = b.reshape(1, N).astype(jnp.float32)
    w_bf16 = w_t.astype(jnp.bfloat16)

    bytes_accessed = (
        x.size * x.dtype.itemsize          # x read
        + w_bf16.size * 2                  # bf16 weight read (dominant)
        + b2.size * 4                      # bias read
        + B * N * 4                        # f32 output write
    )
    cost = pl.CostEstimate(
        flops=2 * B * K * N,
        transcendentals=0,
        bytes_accessed=bytes_accessed,
    )

    return pl.pallas_call(
        _linear_kernel,
        out_shape=jax.ShapeDtypeStruct((B, N), jnp.float32),
        grid_spec=pltpu.PrefetchScalarGridSpec(
            num_scalar_prefetch=0,
            grid=(N // tn,),
            in_specs=[
                pl.BlockSpec((B, K), lambda j: (0, 0)),    # x: full, VMEM-resident
                pl.BlockSpec((K, tn), lambda j: (0, j)),   # W_t: bf16 column tile
                pl.BlockSpec((1, tn), lambda j: (0, j)),   # bias: tiled (no in-kernel slice)
            ],
            out_specs=pl.BlockSpec((B, tn), lambda j: (0, j)),
        ),
        compiler_params=pltpu.CompilerParams(
            dimension_semantics=("parallel",),   # v7x: 2 tiles -> 2 TensorCores
        ),
        cost_estimate=cost,
    )(x, w_bf16, b2)


def onehot16_forward(x, w_t, b, *, tn=None):
    """x: [B, 128] f32, w_t: [128, 4096] bf16 (pre-transposed), b: [4096] f32."""
    if tn is None:
        tn = _default_tn()
    return _onehot16_forward_impl(x, w_t, b, tn=tn)


def init_params(key):
    """Deterministic init mimicking PyTorch Linear default (uniform +-1/sqrt(fan_in))."""
    kw, kb = jax.random.split(key)
    bound = 1.0 / jnp.sqrt(jnp.float32(IN_FEATURES))
    # PyTorch stores weight as [out, in]; we keep the transposed [in, out] copy,
    # cast to bf16 (weight stream dominates HBM traffic on this BW-bound kernel).
    w = jax.random.uniform(kw, (OUT_FEATURES, IN_FEATURES), jnp.float32,
                           minval=-bound, maxval=bound)
    b = jax.random.uniform(kb, (OUT_FEATURES,), jnp.float32,
                           minval=-bound, maxval=bound)
    return w.T.astype(jnp.bfloat16), b  # ([128, 4096] bf16, [4096] f32)


if __name__ == "__main__":
    key = jax.random.PRNGKey(0)
    k_x, k_p = jax.random.split(key)

    batch = 8
    x = jax.random.normal(k_x, (batch, IN_FEATURES), jnp.float32)
    w_t, b = init_params(k_p)

    out = onehot16_forward(x, w_t, b)
    out = jax.block_until_ready(out)

    # Reference with the same bf16 rounding as the kernel (bf16 x, bf16 W, f32 acc + f32 bias).
    ref = jnp.dot(x.astype(jnp.bfloat16), w_t,
                  preferred_element_type=jnp.float32) + b[None, :]
    ref = jax.block_until_ready(ref)

    assert out.shape == (batch, OUT_FEATURES), out.shape
    max_err = float(jnp.abs(out - ref).max())
    assert jnp.allclose(out, ref, atol=2e-2, rtol=2e-2), max_err

    print("KERNEL_OK")
</pallas_src>

<mosaic_0001>
module attributes {stable_mosaic.version = 11 : i64} {
  func.func @_linear_kernel(%arg0: i32, %arg1: memref<8x128xf32, #tpu.memory_space<vmem>>, %arg2: memref<128x4096xbf16, #tpu.memory_space<vmem>>, %arg3: memref<1x4096xf32, #tpu.memory_space<vmem>>, %arg4: memref<8x4096xf32, #tpu.memory_space<vmem>>) attributes {dimension_semantics = [#tpu.dimension_semantics<parallel>], iteration_bounds = array<i64: 1>, scalar_prefetch = 0 : i64, scratch_operands = 0 : i64, tpu.core_type = #tpu.core_type<tc>, window_params = [{pipeline_mode = #tpu.pipeline_mode<synchronous>, transform_indices = @transform_0, window_bounds = array<i64: 8, 128>}, {transform_indices = @transform_1, window_bounds = array<i64: 128, 4096>}, {transform_indices = @transform_2, window_bounds = array<i64: 1, 4096>}, {transform_indices = @transform_3, window_bounds = array<i64: 8, 4096>}]} {
    %c0 = arith.constant 0 : index
    %c0_0 = arith.constant 0 : index
    %0 = vector.load %arg1[%c0, %c0_0] : memref<8x128xf32, #tpu.memory_space<vmem>>, vector<8x128xf32>
    %1 = arith.truncf %0 : vector<8x128xf32> to vector<8x128xbf16>
    %c0_1 = arith.constant 0 : index
    %c0_2 = arith.constant 0 : index
    %2 = vector.load %arg2[%c0_1, %c0_2] : memref<128x4096xbf16, #tpu.memory_space<vmem>>, vector<128x4096xbf16>
    %cst = arith.constant dense<0.000000e+00> : vector<8x4096xf32>
    %3 = tpu.matmul %1, %2, %cst {dimension_numbers = #tpu.dot_dimension_numbers<[1], [0], [0], [1], [0, 0, 1, 1], [], []>} : vector<8x128xbf16>, vector<128x4096xbf16>, vector<8x4096xf32> -> vector<8x4096xf32>
    %c0_3 = arith.constant 0 : index
    %c0_4 = arith.constant 0 : index
    %4 = vector.load %arg3[%c0_3, %c0_4] : memref<1x4096xf32, #tpu.memory_space<vmem>>, vector<1x4096xf32>
    %5 = vector.broadcast %4 : vector<1x4096xf32> to vector<8x4096xf32>
    %6 = arith.addf %3, %5 : vector<8x4096xf32>
    %c0_5 = arith.constant 0 : index
    %c0_6 = arith.constant 0 : index
    %7 = vector.load %arg4[%c0_5, %c0_6] : memref<8x4096xf32, #tpu.memory_space<vmem>>, vector<8x4096xf32>
    tpu.vector_store %arg4[%c0_5, %c0_6], %6 {strides = array<i32>} : memref<8x4096xf32, #tpu.memory_space<vmem>>, vector<8x4096xf32>,
    return
  }
  func.func @transform_0(%arg0: i32) -> (i32, i32) {
    %c0_i32 = arith.constant 0 : i32
    %c0_i32_0 = arith.constant 0 : i32
    %c0_i32_1 = arith.constant 0 : i32
    return %c0_i32, %c0_i32_0 : i32, i32
  }
  func.func @transform_1(%arg0: i32) -> (i32, i32) {
    %c0_i32 = arith.constant 0 : i32
    %c0_i32_0 = arith.constant 0 : i32
    return %c0_i32, %arg0 : i32, i32
  }
  func.func @transform_2(%arg0: i32) -> (i32, i32) {
    %c0_i32 = arith.constant 0 : i32
    %c0_i32_0 = arith.constant 0 : i32
    return %c0_i32, %arg0 : i32, i32
  }
  func.func @transform_3(%arg0: i32) -> (i32, i32) {
    %c0_i32 = arith.constant 0 : i32
    %c0_i32_0 = arith.constant 0 : i32
    return %c0_i32, %arg0 : i32, i32
  }
}

</mosaic_0001>

<bundles_post_ra>
// kernel: _onehot16_forward_impl.1
= control target key start
LH: loop header
LB: loop body
LE: loop exit
PB: predicated region body
PF: predicated region fallthrough
CT: control target
= control target key end

     0   :  { %8 = vsyncpa [#allocation3], 0  ;;  %s2953_s0 = inlined_call_operand.hbm [shape: f32[8,128], index: 0, kind: input, shape index: {}]   ;;  %s2954_s1 = inlined_call_operand.hbm [shape: bf16[128,4096], index: 1, kind: input, shape index: {}]   ;;  %s2955_s2 = inlined_call_operand.hbm [shape: f32[1,4096], index: 2, kind: input, shape index: {}]   ;;  %s2956_s3 = inlined_call_operand.hbm [shape: f32[8,4096], index: 3, kind: output, shape index: {}]  }
   0x1   :  { %9 = vsyncpa [#allocation6], 0 }
   0x2   :  { %10 = vsyncpa [#allocation4], 0  ;;  %s2812_s12 = smov [#allocation5]  }
   0x3   :  { %s26_s13 = sshll.u32 %s2812_s12, 4  ;;  %s27_s13 = int_to_ptr.vmem [resolvable:$true] %s26_s13 }
   0x4   :  { %s2734_s14 = scalar_lea.vmem %s27_s13, 32768  ;;  %p2739_p1 = scmp.lt.s32.totalorder %s27_s13, %s27_s13 }
   0x5   :  { %p2735_p0 = scmp.ne.s32.totalorder %s27_s13, %s2734_s14  ;;  %p2740_p2 = scmp.lt.s32.totalorder %s2734_s14, %s2734_s14 }
   0x7   :  { %p2741_p3 = por %p2740_p2, %p2739_p1 }
   0x9   :  { %p2742_p4 = pnand %p2741_p3, %p2735_p0 }
   0xb   :  { %2745 = shalt.err (!%p2742_p4)
}
   0xc   :  { %s2813_s15 = smov 2048   ;;  %s2814_s16 = smov 128  }
   0xd   :  { %32 = dma.hbm_to_vmem [thread:$0]  %s2954_s1, 32768, %s27_s13, [#allocation6], %s2813_s15, %s2813_s15, %s2814_s16  }
   0xe   :  { %s2815_s19 = smov [#allocation2]   ;;  %s2816_s21 = smov [#allocation7]  }
   0xf   :  { %s17_s20 = sshll.u32 %s2815_s19, 4  ;;  %s39_s22 = sshll.u32 %s2816_s21, 4  ;;  %s18_s20 = int_to_ptr.vmem [resolvable:$true] %s17_s20  ;;  %s40_s22 = int_to_ptr.vmem [resolvable:$true] %s39_s22 }
  0x10   :  { %s2754_s23 = scalar_lea.vmem %s18_s20, 128  ;;  %p2759_p6 = scmp.lt.s32.totalorder %s18_s20, %s18_s20 }
  0x11   :  { %p2755_p5 = scmp.ne.s32.totalorder %s18_s20, %s2754_s23  ;;  %p2760_p7 = scmp.lt.s32.totalorder %s2754_s23, %s2754_s23 }
  0x13   :  { %p2761_p8 = por %p2760_p7, %p2759_p6 }
  0x15   :  { %p2762_p9 = pnand %p2761_p8, %p2755_p5 }
  0x17   :  { %2765 = shalt.err (!%p2762_p9)
}
  0x18   :  { %20 = dma.hbm_to_vmem [thread:$0]  %s2953_s0, 128, %s18_s20, [#allocation3]  }
  0x19   :  { %s2774_s26 = scalar_lea.vmem %s40_s22, 512  ;;  %p2779_p11 = scmp.lt.s32.totalorder %s40_s22, %s40_s22 }
  0x1a   :  { %p2775_p10 = scmp.ne.s32.totalorder %s40_s22, %s2774_s26  ;;  %p2780_p12 = scmp.lt.s32.totalorder %s2774_s26, %s2774_s26 }
  0x1c   :  { %p2781_p13 = por %p2780_p12, %p2779_p11 }
  0x1e   :  { %p2782_p0 = pnand %p2781_p13, %p2775_p10 }
  0x20   :  { %2785 = shalt.err (!%p2782_p0)
}
  0x21   :  { %42 = dma.hbm_to_vmem [thread:$0]  %s2955_s2, 512, %s40_s22, [#allocation6]  }
  0x22   :  { %2806 = dma.done.wait [#allocation3], 128  }
  0x23   :  { %2807 = vsyncadd [#allocation3], 4294967168 }
  0x24   :  { %2808 = dma.done.wait [#allocation6], 33280  }
  0x25   :  { %2809 = vsyncadd [#allocation6], 4294934016  ;;  %v2817_v0 = vmov 0   ;;  %v279_v1 = vld [vmem:[#allocation5 + $0x700] sm:$0xff]  ;;  %v280_v3 = vld [vmem:[#allocation5 + $0x708] sm:$0xff]  ;;  %s2818_s0 = smov [#allocation8]  }
  0x26   :  { %1791 = vmatprep.mubr.bf16.mxu0 %v2817_v0  ;;  %1832 = vmatprep.mubr.bf16.mxu1 %v2817_v0  ;;  %v295_v2 = vld [vmem:[#allocation5 + $0x780] sm:$0xff]  ;;  %v296_v5 = vld [vmem:[#allocation5 + $0x788] sm:$0xff]  ;;  %v281_v63 = vld [vmem:[#allocation5 + $0x710] sm:$0xff]  ;;  %s2453_s2 = sshll.u32 %s2818_s0, 4  ;;  %s2454_s2 = int_to_ptr.vmem [resolvable:$true] %s2453_s2 }
  0x27   :  { %v2688_v4 = vcombine.high %v279_v1, %v295_v2  ;;  %v2687_v6 = vcombine.low %v279_v1, %v295_v2  ;;  %v247_v7 = vld [vmem:[#allocation5 + $0x600] sm:$0xff]  ;;  %v2690_v9 = vcombine.high %v280_v3, %v296_v5  ;;  %v2689_v10 = vcombine.low %v280_v3, %v296_v5  ;;  %v248_v12 = vld [vmem:[#allocation5 + $0x608] sm:$0xff]  ;;  %v297_v1 = vld [vmem:[#allocation5 + $0x790] sm:$0xff]  ;;  %s2786_s28 = scalar_lea.vmem %s2454_s2, 4096  ;;  %p2791_p2 = scmp.lt.s32.totalorder %s2454_s2, %s2454_s2 }
  0x28   :  { %v263_v8 = vld [vmem:[#allocation5 + $0x680] sm:$0xff]  ;;  %v264_v13 = vld [vmem:[#allocation5 + $0x688] sm:$0xff]  ;;  %v282_v2 = vld [vmem:[#allocation5 + $0x718] sm:$0xff]  ;;  %p2787_p1 = scmp.ne.s32.totalorder %s2454_s2, %s2786_s28  ;;  %p2792_p3 = scmp.lt.s32.totalorder %s2786_s28, %s2786_s28 }
  0x29   :  { %v2656_v11 = vcombine.high %v247_v7, %v263_v8  ;;  %v215_v14 = vld [vmem:[#allocation5 + $0x500] sm:$0xff]  ;;  %1759 = vmatprep.subr.bf16.mxu0 %v2688_v4  ;;  %v2658_v15 = vcombine.high %v248_v12, %v264_v13  ;;  %v216_v17 = vld [vmem:[#allocation5 + $0x508] sm:$0xff]  ;;  %1800 = vmatprep.subr.bf16.mxu1 %v2690_v9  ;;  %v2655_v19 = vcombine.low %v247_v7, %v263_v8  ;;  %v298_v3 = vld [vmem:[#allocation5 + $0x798] sm:$0xff] }
  0x2a   :  { %v231_v16 = vld [vmem:[#allocation5 + $0x580] sm:$0xff]  ;;  %v232_v18 = vld [vmem:[#allocation5 + $0x588] sm:$0xff]  ;;  %1760 = vmatpush1.bf16.msra.mxu0 %v2687_v6  ;;  %1801 = vmatpush1.bf16.msra.mxu1 %v2689_v10  ;;  %v2657_v20 = vcombine.low %v248_v12, %v264_v13  ;;  %v53_v5 = vld [vmem:[#allocation2] sm:$0xff]  ;;  %v2692_v7 = vcombine.high %v281_v63, %v297_v1  ;;  %v2694_v8 = vcombine.high %v282_v2, %v298_v3  ;;  %p2793_p4 = por %p2792_p3, %p2791_p2 }
  0x2b   :  { %1761 = vmatprep.subr.bf16.mxu0 %v2656_v11  ;;  %v2624_v21 = vcombine.high %v215_v14, %v231_v16  ;;  %1802 = vmatprep.subr.bf16.mxu1 %v2658_v15  ;;  %v2626_v22 = vcombine.high %v216_v17, %v232_v18  ;;  %v183_v23 = vld [vmem:[#allocation5 + $0x400] sm:$0xff]  ;;  %v184_v25 = vld [vmem:[#allocation5 + $0x408] sm:$0xff]  ;;  %v2623_v27 = vcombine.low %v215_v14, %v231_v16  ;;  %v249_v9 = vld [vmem:[#allocation5 + $0x610] sm:$0xff] }
  0x2c   :  { %v199_v24 = vld [vmem:[#allocation5 + $0x480] sm:$0xff]  ;;  %v200_v26 = vld [vmem:[#allocation5 + $0x488] sm:$0xff]  ;;  %v2625_v28 = vcombine.low %v216_v17, %v232_v18  ;;  %v265_v10 = vld [vmem:[#allocation5 + $0x690] sm:$0xff]  ;;  %v2850_v11 = vpack.c.bf16 %v53_v5, %v53_v5  ;;  %v2691_v14 = vcombine.low %v281_v63, %v297_v1  ;;  %v2693_v15 = vcombine.low %v282_v2, %v298_v3  ;;  %p2794_p5 = pnand %p2793_p4, %p2787_p1 }
  0x2d   :  { %v2592_v29 = vcombine.high %v183_v23, %v199_v24  ;;  %v2594_v30 = vcombine.high %v184_v25, %v200_v26  ;;  %v151_v31 = vld [vmem:[#allocation5 + $0x300] sm:$0xff]  ;;  %v152_v33 = vld [vmem:[#allocation5 + $0x308] sm:$0xff]  ;;  %v2591_v35 = vcombine.low %v183_v23, %v199_v24  ;;  %v2593_v36 = vcombine.low %v184_v25, %v200_v26  ;;  %v250_v12 = vld [vmem:[#allocation5 + $0x618] sm:$0xff] }
  0x2e   :  { %1762 = vmatpush1.bf16.msra.mxu0 %v2655_v19  ;;  %1803 = vmatpush1.bf16.msra.mxu1 %v2657_v20  ;;  %v167_v32 = vld [vmem:[#allocation5 + $0x380] sm:$0xff]  ;;  %v168_v34 = vld [vmem:[#allocation5 + $0x388] sm:$0xff]  ;;  %v266_v13 = vld [vmem:[#allocation5 + $0x698] sm:$0xff]  ;;  %v2660_v16 = vcombine.high %v249_v9, %v265_v10 }
  0x2f   :  { %1763 = vmatprep.subr.bf16.mxu0 %v2624_v21  ;;  %1804 = vmatprep.subr.bf16.mxu1 %v2626_v22  ;;  %v2560_v37 = vcombine.high %v151_v31, %v167_v32  ;;  %v2562_v38 = vcombine.high %v152_v33, %v168_v34  ;;  %v119_v39 = vld [vmem:[#allocation5 + $0x200] sm:$0xff]  ;;  %v120_v41 = vld [vmem:[#allocation5 + $0x208] sm:$0xff]  ;;  %v2559_v43 = vcombine.low %v151_v31, %v167_v32  ;;  %v217_v18 = vld [vmem:[#allocation5 + $0x510] sm:$0xff] }
  0x30   :  { %v135_v40 = vld [vmem:[#allocation5 + $0x280] sm:$0xff]  ;;  %v136_v42 = vld [vmem:[#allocation5 + $0x288] sm:$0xff]  ;;  %v2561_v44 = vcombine.low %v152_v33, %v168_v34  ;;  %v2662_v17 = vcombine.high %v250_v12, %v266_v13  ;;  %v233_v19 = vld [vmem:[#allocation5 + $0x590] sm:$0xff]  ;;  %v2659_v22 = vcombine.low %v249_v9, %v265_v10  ;;  %v2661_v23 = vcombine.low %v250_v12, %v266_v13 }
  0x31   :  { %v2528_v45 = vcombine.high %v119_v39, %v135_v40  ;;  %v2530_v46 = vcombine.high %v120_v41, %v136_v42  ;;  %v87_v47 = vld [vmem:[#allocation5 + $0x100] sm:$0xff]  ;;  %v88_v49 = vld [vmem:[#allocation5 + $0x108] sm:$0xff]  ;;  %v2527_v51 = vcombine.low %v119_v39, %v135_v40  ;;  %v2529_v52 = vcombine.low %v120_v41, %v136_v42  ;;  %v218_v20 = vld [vmem:[#allocation5 + $0x518] sm:$0xff] }
  0x32   :  { %1764 = vmatpush1.bf16.msra.mxu0 %v2623_v27  ;;  %1805 = vmatpush1.bf16.msra.mxu1 %v2625_v28  ;;  %v103_v48 = vld [vmem:[#allocation5 + $0x180] sm:$0xff]  ;;  %v104_v50 = vld [vmem:[#allocation5 + $0x188] sm:$0xff]  ;;  %v234_v21 = vld [vmem:[#allocation5 + $0x598] sm:$0xff]  ;;  %v2628_v24 = vcombine.high %v217_v18, %v233_v19 }
  0x33   :  { %1765 = vmatprep.subr.bf16.mxu0 %v2592_v29  ;;  %1806 = vmatprep.subr.bf16.mxu1 %v2594_v30  ;;  %v2496_v53 = vcombine.high %v87_v47, %v103_v48  ;;  %v2498_v54 = vcombine.high %v88_v49, %v104_v50  ;;  %v55_v55 = vld [vmem:[#allocation5] sm:$0xff]  ;;  %v56_v57 = vld [vmem:[#allocation5 + $0x8] sm:$0xff]  ;;  %v2495_v59 = vcombine.low %v87_v47, %v103_v48  ;;  %v185_v26 = vld [vmem:[#allocation5 + $0x410] sm:$0xff] }
  0x34   :  { %v71_v56 = vld [vmem:[#allocation5 + $0x80] sm:$0xff]  ;;  %v72_v58 = vld [vmem:[#allocation5 + $0x88] sm:$0xff]  ;;  %v2497_v60 = vcombine.low %v88_v49, %v104_v50  ;;  %v2630_v25 = vcombine.high %v218_v20, %v234_v21  ;;  %v201_v27 = vld [vmem:[#allocation5 + $0x490] sm:$0xff]  ;;  %v2627_v30 = vcombine.low %v217_v18, %v233_v19  ;;  %v2629_v31 = vcombine.low %v218_v20, %v234_v21 }
  0x35   :  { %v2464_v61 = vcombine.high %v55_v55, %v71_v56  ;;  %v2466_v62 = vcombine.high %v56_v57, %v72_v58  ;;  %v2463_v4 = vcombine.low %v55_v55, %v71_v56  ;;  %v2465_v6 = vcombine.low %v56_v57, %v72_v58  ;;  %v186_v28 = vld [vmem:[#allocation5 + $0x418] sm:$0xff]  ;;  %v153_v34 = vld [vmem:[#allocation5 + $0x310] sm:$0xff]  ;;  %v283_v3 = vld [vmem:[#allocation5 + $0x720] sm:$0xff] }
  0x36   :  { %1766 = vmatpush1.bf16.msra.mxu0 %v2591_v35  ;;  %1807 = vmatpush1.bf16.msra.mxu1 %v2593_v36  ;;  %v202_v29 = vld [vmem:[#allocation5 + $0x498] sm:$0xff]  ;;  %v2596_v32 = vcombine.high %v185_v26, %v201_v27  ;;  %v169_v35 = vld [vmem:[#allocation5 + $0x390] sm:$0xff]  ;;  %v284_v5 = vld [vmem:[#allocation5 + $0x728] sm:$0xff] }
  0x37   :  { %1767 = vmatprep.subr.bf16.mxu0 %v2560_v37  ;;  %1808 = vmatprep.subr.bf16.mxu1 %v2562_v38  ;;  %v2598_v33 = vcombine.high %v186_v28, %v202_v29  ;;  %v154_v36 = vld [vmem:[#allocation5 + $0x318] sm:$0xff]  ;;  %v2595_v38 = vcombine.low %v185_v26, %v201_v27  ;;  %v2597_v39 = vcombine.low %v186_v28, %v202_v29  ;;  %v121_v42 = vld [vmem:[#allocation5 + $0x210] sm:$0xff]  ;;  %v251_v12 = vld [vmem:[#allocation5 + $0x620] sm:$0xff] }
  0x38   :  { %v170_v37 = vld [vmem:[#allocation5 + $0x398] sm:$0xff]  ;;  %v2564_v40 = vcombine.high %v153_v34, %v169_v35  ;;  %v89_v50 = vld [vmem:[#allocation5 + $0x110] sm:$0xff]  ;;  %v267_v13 = vld [vmem:[#allocation5 + $0x6a0] sm:$0xff] }
  0x39   :  { %v2566_v41 = vcombine.high %v154_v36, %v170_v37  ;;  %v2565_v47 = vcombine.low %v154_v36, %v170_v37  ;;  %v57_v58 = vld [vmem:[#allocation5 + $0x10] sm:$0xff]  ;;  %v2664_v18 = vcombine.high %v251_v12, %v267_v13  ;;  %v219_v20 = vld [vmem:[#allocation5 + $0x520] sm:$0xff] }
  0x3a   :  { %1768 = vmatpush1.bf16.msra.mxu0 %v2559_v43  ;;  %1809 = vmatpush1.bf16.msra.mxu1 %v2561_v44  ;;  %v137_v43 = vld [vmem:[#allocation5 + $0x290] sm:$0xff]  ;;  %v122_v44 = vld [vmem:[#allocation5 + $0x218] sm:$0xff]  ;;  %v235_v21 = vld [vmem:[#allocation5 + $0x5a0] sm:$0xff] }
  0x3b   :  { %1769 = vmatprep.subr.bf16.mxu0 %v2528_v45  ;;  %1810 = vmatprep.subr.bf16.mxu1 %v2530_v46  ;;  %v138_v45 = vld [vmem:[#allocation5 + $0x298] sm:$0xff]  ;;  %v2563_v46 = vcombine.low %v153_v34, %v169_v35  ;;  %v2532_v48 = vcombine.high %v121_v42, %v137_v43  ;;  %v2632_v26 = vcombine.high %v219_v20, %v235_v21  ;;  %v187_v28 = vld [vmem:[#allocation5 + $0x420] sm:$0xff] }
  0x3c   :  { %v2534_v49 = vcombine.high %v122_v44, %v138_v45  ;;  %v2533_v55 = vcombine.low %v122_v44, %v138_v45  ;;  %v203_v29 = vld [vmem:[#allocation5 + $0x4a0] sm:$0xff] }
  0x3d   :  { %v2600_v34 = vcombine.high %v187_v28, %v203_v29  ;;  %v155_v36 = vld [vmem:[#allocation5 + $0x320] sm:$0xff] }
  0x3e   :  { %1770 = vmatpush1.bf16.msra.mxu0 %v2527_v51  ;;  %1811 = vmatpush1.bf16.msra.mxu1 %v2529_v52  ;;  %v105_v51 = vld [vmem:[#allocation5 + $0x190] sm:$0xff]  ;;  %v90_v52 = vld [vmem:[#allocation5 + $0x118] sm:$0xff]  ;;  %v171_v37 = vld [vmem:[#allocation5 + $0x3a0] sm:$0xff] }
  0x3f   :  { %1771 = vmatprep.subr.bf16.mxu0 %v2496_v53  ;;  %1812 = vmatprep.subr.bf16.mxu1 %v2498_v54  ;;  %v106_v53 = vld [vmem:[#allocation5 + $0x198] sm:$0xff]  ;;  %v2531_v54 = vcombine.low %v121_v42, %v137_v43  ;;  %v2500_v56 = vcombine.high %v89_v50, %v105_v51  ;;  %v2568_v42 = vcombine.high %v155_v36, %v171_v37  ;;  %v123_v44 = vld [vmem:[#allocation5 + $0x220] sm:$0xff] }
  0x40   :  { %v2502_v57 = vcombine.high %v90_v52, %v106_v53  ;;  %v2501_v63 = vcombine.low %v90_v52, %v106_v53  ;;  %v139_v45 = vld [vmem:[#allocation5 + $0x2a0] sm:$0xff] }
  0x41   :  { %v91_v52 = vld [vmem:[#allocation5 + $0x120] sm:$0xff] }
  0x42   :  { %1772 = vmatpush1.bf16.msra.mxu0 %v2495_v59  ;;  %1813 = vmatpush1.bf16.msra.mxu1 %v2497_v60  ;;  %v73_v59 = vld [vmem:[#allocation5 + $0x90] sm:$0xff]  ;;  %v58_v60 = vld [vmem:[#allocation5 + $0x18] sm:$0xff]  ;;  %v107_v53 = vld [vmem:[#allocation5 + $0x1a0] sm:$0xff] }
  0x43   :  { %1773 = vmatprep.subr.bf16.mxu0 %v2464_v61  ;;  %1814 = vmatprep.subr.bf16.mxu1 %v2466_v62  ;;  %v74_v61 = vld [vmem:[#allocation5 + $0x98] sm:$0xff]  ;;  %v2499_v62 = vcombine.low %v89_v50, %v105_v51  ;;  %v2468_v1 = vcombine.high %v57_v58, %v73_v59  ;;  %v2536_v50 = vcombine.high %v123_v44, %v139_v45 }
  0x44   :  { %v2470_v2 = vcombine.high %v58_v60, %v74_v61 }
  0x46   :  { %1774 = vmatpush1.bf16.msra.mxu0 %v2463_v4  ;;  %1815 = vmatpush1.bf16.msra.mxu1 %v2465_v6  ;;  %v299_v4 = vld [vmem:[#allocation5 + $0x7a0] sm:$0xff]  ;;  %v300_v6 = vld [vmem:[#allocation5 + $0x7a8] sm:$0xff] }
  0x47   :  { %1841 = vmatprep.subr.bf16.mxu0 %v2692_v7  ;;  %1882 = vmatprep.subr.bf16.mxu1 %v2694_v8  ;;  %v2467_v7 = vcombine.low %v57_v58, %v73_v59  ;;  %v2469_v8 = vcombine.low %v58_v60, %v74_v61  ;;  %v2696_v9 = vcombine.high %v283_v3, %v299_v4  ;;  %v59_v60 = vld [vmem:[#allocation5 + $0x20] sm:$0xff] }
  0x48   :  { %v2698_v10 = vcombine.high %v284_v5, %v300_v6  ;;  %v2504_v58 = vcombine.high %v91_v52, %v107_v53  ;;  %v75_v61 = vld [vmem:[#allocation5 + $0xa0] sm:$0xff] }
  0x49   :  { %1792 = vmatmul.mubr.bf16.vlgmr.msra.gmra.mxu0 %v2850_v11  ;;  %1833 = vmatmul.mubr.bf16.vlgmr.msra.gmra.mxu1 %v2850_v11 }
  0x4a   :  { %1842 = vmatpush1.bf16.msra.mxu0 %v2691_v14  ;;  %1883 = vmatpush1.bf16.msra.mxu1 %v2693_v15  ;;  %v252_v14 = vld [vmem:[#allocation5 + $0x628] sm:$0xff] }
  0x4b   :  { %1843 = vmatprep.subr.bf16.mxu0 %v2660_v16  ;;  %1884 = vmatprep.subr.bf16.mxu1 %v2662_v17  ;;  %v268_v15 = vld [vmem:[#allocation5 + $0x6a8] sm:$0xff]  ;;  %v2695_v16 = vcombine.low %v283_v3, %v299_v4  ;;  %v2697_v17 = vcombine.low %v284_v5, %v300_v6  ;;  %v2472_v3 = vcombine.high %v59_v60, %v75_v61  ;;  %v285_v5 = vld [vmem:[#allocation5 + $0x730] sm:$0xff] }
  0x4c   :  { %1873 = vmatprep.mubr.bf16.mxu0 %v2817_v0  ;;  %1914 = vmatprep.mubr.bf16.mxu1 %v2817_v0  ;;  %v2666_v19 = vcombine.high %v252_v14, %v268_v15  ;;  %v301_v6 = vld [vmem:[#allocation5 + $0x7b0] sm:$0xff] }
  0x4e   :  { %1844 = vmatpush1.bf16.msra.mxu0 %v2659_v22  ;;  %1885 = vmatpush1.bf16.msra.mxu1 %v2661_v23  ;;  %v220_v22 = vld [vmem:[#allocation5 + $0x528] sm:$0xff] }
  0x4f   :  { %1845 = vmatprep.subr.bf16.mxu0 %v2628_v24  ;;  %1886 = vmatprep.subr.bf16.mxu1 %v2630_v25  ;;  %v236_v23 = vld [vmem:[#allocation5 + $0x5a8] sm:$0xff]  ;;  %v2663_v24 = vcombine.low %v251_v12, %v267_v13  ;;  %v2665_v25 = vcombine.low %v252_v14, %v268_v15  ;;  %v2700_v12 = vcombine.high %v285_v5, %v301_v6  ;;  %v253_v14 = vld [vmem:[#allocation5 + $0x630] sm:$0xff] }
  0x50   :  { %v2634_v27 = vcombine.high %v220_v22, %v236_v23  ;;  %v269_v15 = vld [vmem:[#allocation5 + $0x6b0] sm:$0xff] }
  0x52   :  { %1846 = vmatpush1.bf16.msra.mxu0 %v2627_v30  ;;  %1887 = vmatpush1.bf16.msra.mxu1 %v2629_v31  ;;  %v188_v30 = vld [vmem:[#allocation5 + $0x428] sm:$0xff] }
  0x53   :  { %1847 = vmatprep.subr.bf16.mxu0 %v2596_v32  ;;  %1888 = vmatprep.subr.bf16.mxu1 %v2598_v33  ;;  %v204_v31 = vld [vmem:[#allocation5 + $0x4a8] sm:$0xff]  ;;  %v2631_v32 = vcombine.low %v219_v20, %v235_v21  ;;  %v2633_v33 = vcombine.low %v220_v22, %v236_v23  ;;  %v2668_v20 = vcombine.high %v253_v14, %v269_v15  ;;  %v221_v22 = vld [vmem:[#allocation5 + $0x530] sm:$0xff] }
  0x54   :  { %v2602_v35 = vcombine.high %v188_v30, %v204_v31  ;;  %v237_v23 = vld [vmem:[#allocation5 + $0x5b0] sm:$0xff] }
  0x56   :  { %1848 = vmatpush1.bf16.msra.mxu0 %v2595_v38  ;;  %1889 = vmatpush1.bf16.msra.mxu1 %v2597_v39  ;;  %v156_v38 = vld [vmem:[#allocation5 + $0x328] sm:$0xff] }
  0x57   :  { %1849 = vmatprep.subr.bf16.mxu0 %v2564_v40  ;;  %1890 = vmatprep.subr.bf16.mxu1 %v2566_v41  ;;  %v172_v39 = vld [vmem:[#allocation5 + $0x3a8] sm:$0xff]  ;;  %v2599_v40 = vcombine.low %v187_v28, %v203_v29  ;;  %v2601_v41 = vcombine.low %v188_v30, %v204_v31  ;;  %v2636_v28 = vcombine.high %v221_v22, %v237_v23  ;;  %v189_v30 = vld [vmem:[#allocation5 + $0x430] sm:$0xff] }
  0x58   :  { %v2570_v43 = vcombine.high %v156_v38, %v172_v39  ;;  %v205_v31 = vld [vmem:[#allocation5 + $0x4b0] sm:$0xff] }
  0x5a   :  { %1850 = vmatpush1.bf16.msra.mxu0 %v2563_v46  ;;  %1891 = vmatpush1.bf16.msra.mxu1 %v2565_v47  ;;  %v124_v46 = vld [vmem:[#allocation5 + $0x228] sm:$0xff] }
  0x5b   :  { %1851 = vmatprep.subr.bf16.mxu0 %v2532_v48  ;;  %1892 = vmatprep.subr.bf16.mxu1 %v2534_v49  ;;  %v140_v47 = vld [vmem:[#allocation5 + $0x2a8] sm:$0xff]  ;;  %v2567_v48 = vcombine.low %v155_v36, %v171_v37  ;;  %v2569_v49 = vcombine.low %v156_v38, %v172_v39  ;;  %v2604_v36 = vcombine.high %v189_v30, %v205_v31  ;;  %v157_v38 = vld [vmem:[#allocation5 + $0x330] sm:$0xff] }
  0x5c   :  { %v2538_v51 = vcombine.high %v124_v46, %v140_v47  ;;  %v173_v39 = vld [vmem:[#allocation5 + $0x3b0] sm:$0xff] }
  0x5e   :  { %1852 = vmatpush1.bf16.msra.mxu0 %v2531_v54  ;;  %1893 = vmatpush1.bf16.msra.mxu1 %v2533_v55  ;;  %v92_v54 = vld [vmem:[#allocation5 + $0x128] sm:$0xff] }
  0x5f   :  { %1853 = vmatprep.subr.bf16.mxu0 %v2500_v56  ;;  %1894 = vmatprep.subr.bf16.mxu1 %v2502_v57  ;;  %v108_v55 = vld [vmem:[#allocation5 + $0x1a8] sm:$0xff]  ;;  %v2535_v56 = vcombine.low %v123_v44, %v139_v45  ;;  %v2537_v57 = vcombine.low %v124_v46, %v140_v47  ;;  %v2572_v44 = vcombine.high %v157_v38, %v173_v39  ;;  %v125_v46 = vld [vmem:[#allocation5 + $0x230] sm:$0xff] }
  0x60   :  { %v2506_v59 = vcombine.high %v92_v54, %v108_v55  ;;  %v141_v47 = vld [vmem:[#allocation5 + $0x2b0] sm:$0xff] }
  0x62   :  { %1854 = vmatpush1.bf16.msra.mxu0 %v2499_v62  ;;  %1895 = vmatpush1.bf16.msra.mxu1 %v2501_v63  ;;  %v60_v62 = vld [vmem:[#allocation5 + $0x28] sm:$0xff] }
  0x63   :  { %1855 = vmatprep.subr.bf16.mxu0 %v2468_v1  ;;  %1896 = vmatprep.subr.bf16.mxu1 %v2470_v2  ;;  %v76_v63 = vld [vmem:[#allocation5 + $0xa8] sm:$0xff]  ;;  %v2503_v1 = vcombine.low %v91_v52, %v107_v53  ;;  %v2505_v2 = vcombine.low %v92_v54, %v108_v55  ;;  %v2540_v52 = vcombine.high %v125_v46, %v141_v47  ;;  %v93_v54 = vld [vmem:[#allocation5 + $0x130] sm:$0xff] }
  0x64   :  { %v2474_v4 = vcombine.high %v60_v62, %v76_v63  ;;  %v109_v55 = vld [vmem:[#allocation5 + $0x1b0] sm:$0xff] }
  0x66   :  { %1856 = vmatpush1.bf16.msra.mxu0 %v2467_v7  ;;  %1897 = vmatpush1.bf16.msra.mxu1 %v2469_v8  ;;  %v286_v7 = vld [vmem:[#allocation5 + $0x738] sm:$0xff] }
  0x67   :  { %1923 = vmatprep.subr.bf16.mxu0 %v2696_v9  ;;  %1964 = vmatprep.subr.bf16.mxu1 %v2698_v10  ;;  %v302_v8 = vld [vmem:[#allocation5 + $0x7b8] sm:$0xff]  ;;  %v2471_v9 = vcombine.low %v59_v60, %v75_v61  ;;  %v2473_v10 = vcombine.low %v60_v62, %v76_v63  ;;  %v2508_v60 = vcombine.high %v93_v54, %v109_v55  ;;  %v61_v62 = vld [vmem:[#allocation5 + $0x30] sm:$0xff] }
  0x68   :  { %v2702_v13 = vcombine.high %v286_v7, %v302_v8  ;;  %v77_v63 = vld [vmem:[#allocation5 + $0xb0] sm:$0xff] }
  0x69   :  { %1874 = vmatmul.mubr.bf16.vlgmr.msra.gmra.mxu0 %v2850_v11  ;;  %1915 = vmatmul.mubr.bf16.vlgmr.msra.gmra.mxu1 %v2850_v11 }
  0x6a   :  { %1924 = vmatpush1.bf16.msra.mxu0 %v2695_v16  ;;  %1965 = vmatpush1.bf16.msra.mxu1 %v2697_v17  ;;  %v254_v16 = vld [vmem:[#allocation5 + $0x638] sm:$0xff] }
  0x6b   :  { %1925 = vmatprep.subr.bf16.mxu0 %v2664_v18  ;;  %1966 = vmatprep.subr.bf16.mxu1 %v2666_v19  ;;  %v270_v17 = vld [vmem:[#allocation5 + $0x6b8] sm:$0xff]  ;;  %v2699_v18 = vcombine.low %v285_v5, %v301_v6  ;;  %v2701_v19 = vcombine.low %v286_v7, %v302_v8  ;;  %v2476_v5 = vcombine.high %v61_v62, %v77_v63  ;;  %v287_v7 = vld [vmem:[#allocation5 + $0x740] sm:$0xff] }
  0x6c   :  { %1955 = vmatprep.mubr.bf16.mxu0 %v2817_v0  ;;  %1996 = vmatprep.mubr.bf16.mxu1 %v2817_v0  ;;  %v2670_v21 = vcombine.high %v254_v16, %v270_v17  ;;  %v303_v8 = vld [vmem:[#allocation5 + $0x7c0] sm:$0xff] }
  0x6e   :  { %1926 = vmatpush1.bf16.msra.mxu0 %v2663_v24  ;;  %1967 = vmatpush1.bf16.msra.mxu1 %v2665_v25  ;;  %v222_v24 = vld [vmem:[#allocation5 + $0x538] sm:$0xff] }
  0x6f   :  { %1927 = vmatprep.subr.bf16.mxu0 %v2632_v26  ;;  %1968 = vmatprep.subr.bf16.mxu1 %v2634_v27  ;;  %v238_v25 = vld [vmem:[#allocation5 + $0x5b8] sm:$0xff]  ;;  %v2667_v26 = vcombine.low %v253_v14, %v269_v15  ;;  %v2669_v27 = vcombine.low %v254_v16, %v270_v17  ;;  %v2704_v14 = vcombine.high %v287_v7, %v303_v8  ;;  %v255_v16 = vld [vmem:[#allocation5 + $0x640] sm:$0xff] }
  0x70   :  { %v2638_v29 = vcombine.high %v222_v24, %v238_v25  ;;  %v271_v17 = vld [vmem:[#allocation5 + $0x6c0] sm:$0xff] }
  0x72   :  { %1928 = vmatpush1.bf16.msra.mxu0 %v2631_v32  ;;  %1969 = vmatpush1.bf16.msra.mxu1 %v2633_v33  ;;  %v190_v32 = vld [vmem:[#allocation5 + $0x438] sm:$0xff] }
  0x73   :  { %1929 = vmatprep.subr.bf16.mxu0 %v2600_v34  ;;  %1970 = vmatprep.subr.bf16.mxu1 %v2602_v35  ;;  %v206_v33 = vld [vmem:[#allocation5 + $0x4b8] sm:$0xff]  ;;  %v2635_v34 = vcombine.low %v221_v22, %v237_v23  ;;  %v2637_v35 = vcombine.low %v222_v24, %v238_v25  ;;  %v2672_v22 = vcombine.high %v255_v16, %v271_v17  ;;  %v223_v24 = vld [vmem:[#allocation5 + $0x540] sm:$0xff] }
  0x74   :  { %v2606_v37 = vcombine.high %v190_v32, %v206_v33  ;;  %v239_v25 = vld [vmem:[#allocation5 + $0x5c0] sm:$0xff] }
  0x76   :  { %1930 = vmatpush1.bf16.msra.mxu0 %v2599_v40  ;;  %1971 = vmatpush1.bf16.msra.mxu1 %v2601_v41  ;;  %v158_v40 = vld [vmem:[#allocation5 + $0x338] sm:$0xff] }
  0x77   :  { %1931 = vmatprep.subr.bf16.mxu0 %v2568_v42  ;;  %1972 = vmatprep.subr.bf16.mxu1 %v2570_v43  ;;  %v174_v41 = vld [vmem:[#allocation5 + $0x3b8] sm:$0xff]  ;;  %v2603_v42 = vcombine.low %v189_v30, %v205_v31  ;;  %v2605_v43 = vcombine.low %v190_v32, %v206_v33  ;;  %v2640_v30 = vcombine.high %v223_v24, %v239_v25  ;;  %v191_v32 = vld [vmem:[#allocation5 + $0x440] sm:$0xff] }
  0x78   :  { %v2574_v45 = vcombine.high %v158_v40, %v174_v41  ;;  %v207_v33 = vld [vmem:[#allocation5 + $0x4c0] sm:$0xff] }
  0x7a   :  { %1932 = vmatpush1.bf16.msra.mxu0 %v2567_v48  ;;  %1973 = vmatpush1.bf16.msra.mxu1 %v2569_v49  ;;  %v126_v48 = vld [vmem:[#allocation5 + $0x238] sm:$0xff] }
  0x7b   :  { %1933 = vmatprep.subr.bf16.mxu0 %v2536_v50  ;;  %1974 = vmatprep.subr.bf16.mxu1 %v2538_v51  ;;  %v142_v49 = vld [vmem:[#allocation5 + $0x2b8] sm:$0xff]  ;;  %v2571_v50 = vcombine.low %v157_v38, %v173_v39  ;;  %v2573_v51 = vcombine.low %v158_v40, %v174_v41  ;;  %v2608_v38 = vcombine.high %v191_v32, %v207_v33  ;;  %v159_v40 = vld [vmem:[#allocation5 + $0x340] sm:$0xff] }
  0x7c   :  { %v2542_v53 = vcombine.high %v126_v48, %v142_v49  ;;  %v175_v41 = vld [vmem:[#allocation5 + $0x3c0] sm:$0xff] }
  0x7e   :  { %1934 = vmatpush1.bf16.msra.mxu0 %v2535_v56  ;;  %1975 = vmatpush1.bf16.msra.mxu1 %v2537_v57  ;;  %v94_v56 = vld [vmem:[#allocation5 + $0x138] sm:$0xff] }
  0x7f   :  { %1935 = vmatprep.subr.bf16.mxu0 %v2504_v58  ;;  %1976 = vmatprep.subr.bf16.mxu1 %v2506_v59  ;;  %v110_v57 = vld [vmem:[#allocation5 + $0x1b8] sm:$0xff]  ;;  %v2539_v58 = vcombine.low %v125_v46, %v141_v47  ;;  %v2541_v59 = vcombine.low %v126_v48, %v142_v49  ;;  %v2576_v46 = vcombine.high %v159_v40, %v175_v41  ;;  %v127_v48 = vld [vmem:[#allocation5 + $0x240] sm:$0xff] }
  0x80   :  { %v2510_v61 = vcombine.high %v94_v56, %v110_v57  ;;  %v143_v49 = vld [vmem:[#allocation5 + $0x2c0] sm:$0xff] }
  0x82   :  { %1936 = vmatpush1.bf16.msra.mxu0 %v2503_v1  ;;  %1977 = vmatpush1.bf16.msra.mxu1 %v2505_v2  ;;  %v62_v1 = vld [vmem:[#allocation5 + $0x38] sm:$0xff] }
  0x83   :  { %1937 = vmatprep.subr.bf16.mxu0 %v2472_v3  ;;  %1978 = vmatprep.subr.bf16.mxu1 %v2474_v4  ;;  %v78_v2 = vld [vmem:[#allocation5 + $0xb8] sm:$0xff]  ;;  %v2507_v3 = vcombine.low %v93_v54, %v109_v55  ;;  %v2509_v4 = vcombine.low %v94_v56, %v110_v57  ;;  %v2544_v54 = vcombine.high %v127_v48, %v143_v49  ;;  %v95_v56 = vld [vmem:[#allocation5 + $0x140] sm:$0xff] }
  0x84   :  { %v2478_v6 = vcombine.high %v62_v1, %v78_v2  ;;  %v111_v57 = vld [vmem:[#allocation5 + $0x1c0] sm:$0xff] }
  0x86   :  { %1938 = vmatpush1.bf16.msra.mxu0 %v2471_v9  ;;  %1979 = vmatpush1.bf16.msra.mxu1 %v2473_v10  ;;  %v288_v9 = vld [vmem:[#allocation5 + $0x748] sm:$0xff] }
  0x87   :  { %2005 = vmatprep.subr.bf16.mxu0 %v2700_v12  ;;  %2046 = vmatprep.subr.bf16.mxu1 %v2702_v13  ;;  %v304_v10 = vld [vmem:[#allocation5 + $0x7c8] sm:$0xff]  ;;  %v2475_v12 = vcombine.low %v61_v62, %v77_v63  ;;  %v2477_v13 = vcombine.low %v62_v1, %v78_v2  ;;  %v2512_v62 = vcombine.high %v95_v56, %v111_v57  ;;  %v63_v1 = vld [vmem:[#allocation5 + $0x40] sm:$0xff] }
  0x88   :  { %v2706_v15 = vcombine.high %v288_v9, %v304_v10  ;;  %v79_v2 = vld [vmem:[#allocation5 + $0xc0] sm:$0xff] }
  0x89   :  { %1956 = vmatmul.mubr.bf16.vlgmr.msra.gmra.mxu0 %v2850_v11  ;;  %1997 = vmatmul.mubr.bf16.vlgmr.msra.gmra.mxu1 %v2850_v11 }
  0x8a   :  { %2006 = vmatpush1.bf16.msra.mxu0 %v2699_v18  ;;  %2047 = vmatpush1.bf16.msra.mxu1 %v2701_v19  ;;  %v256_v18 = vld [vmem:[#allocation5 + $0x648] sm:$0xff] }
  0x8b   :  { %2007 = vmatprep.subr.bf16.mxu0 %v2668_v20  ;;  %2048 = vmatprep.subr.bf16.mxu1 %v2670_v21  ;;  %v272_v19 = vld [vmem:[#allocation5 + $0x6c8] sm:$0xff]  ;;  %v2703_v20 = vcombine.low %v287_v7, %v303_v8  ;;  %v2705_v21 = vcombine.low %v288_v9, %v304_v10  ;;  %v2480_v7 = vcombine.high %v63_v1, %v79_v2  ;;  %v289_v9 = vld [vmem:[#allocation5 + $0x750] sm:$0xff] }
  0x8c   :  { %2037 = vmatprep.mubr.bf16.mxu0 %v2817_v0  ;;  %2078 = vmatprep.mubr.bf16.mxu1 %v2817_v0  ;;  %v2674_v23 = vcombine.high %v256_v18, %v272_v19  ;;  %v305_v10 = vld [vmem:[#allocation5 + $0x7d0] sm:$0xff] }
  0x8e   :  { %2008 = vmatpush1.bf16.msra.mxu0 %v2667_v26  ;;  %2049 = vmatpush1.bf16.msra.mxu1 %v2669_v27  ;;  %v224_v26 = vld [vmem:[#allocation5 + $0x548] sm:$0xff] }
  0x8f   :  { %2009 = vmatprep.subr.bf16.mxu0 %v2636_v28  ;;  %2050 = vmatprep.subr.bf16.mxu1 %v2638_v29  ;;  %v240_v27 = vld [vmem:[#allocation5 + $0x5c8] sm:$0xff]  ;;  %v2671_v28 = vcombine.low %v255_v16, %v271_v17  ;;  %v2673_v29 = vcombine.low %v256_v18, %v272_v19  ;;  %v2708_v16 = vcombine.high %v289_v9, %v305_v10  ;;  %v257_v18 = vld [vmem:[#allocation5 + $0x650] sm:$0xff] }
  0x90   :  { %v2642_v31 = vcombine.high %v224_v26, %v240_v27  ;;  %v273_v19 = vld [vmem:[#allocation5 + $0x6d0] sm:$0xff] }
  0x92   :  { %2010 = vmatpush1.bf16.msra.mxu0 %v2635_v34  ;;  %2051 = vmatpush1.bf16.msra.mxu1 %v2637_v35  ;;  %v192_v34 = vld [vmem:[#allocation5 + $0x448] sm:$0xff] }
  0x93   :  { %2011 = vmatprep.subr.bf16.mxu0 %v2604_v36  ;;  %2052 = vmatprep.subr.bf16.mxu1 %v2606_v37  ;;  %v208_v35 = vld [vmem:[#allocation5 + $0x4c8] sm:$0xff]  ;;  %v2639_v36 = vcombine.low %v223_v24, %v239_v25  ;;  %v2641_v37 = vcombine.low %v224_v26, %v240_v27  ;;  %v2676_v24 = vcombine.high %v257_v18, %v273_v19  ;;  %v225_v26 = vld [vmem:[#allocation5 + $0x550] sm:$0xff] }
  0x94   :  { %v2610_v39 = vcombine.high %v192_v34, %v208_v35  ;;  %v241_v27 = vld [vmem:[#allocation5 + $0x5d0] sm:$0xff] }
  0x96   :  { %2012 = vmatpush1.bf16.msra.mxu0 %v2603_v42  ;;  %2053 = vmatpush1.bf16.msra.mxu1 %v2605_v43  ;;  %v160_v42 = vld [vmem:[#allocation5 + $0x348] sm:$0xff] }
  0x97   :  { %2013 = vmatprep.subr.bf16.mxu0 %v2572_v44  ;;  %2054 = vmatprep.subr.bf16.mxu1 %v2574_v45  ;;  %v176_v43 = vld [vmem:[#allocation5 + $0x3c8] sm:$0xff]  ;;  %v2607_v44 = vcombine.low %v191_v32, %v207_v33  ;;  %v2609_v45 = vcombine.low %v192_v34, %v208_v35  ;;  %v2644_v32 = vcombine.high %v225_v26, %v241_v27  ;;  %v193_v34 = vld [vmem:[#allocation5 + $0x450] sm:$0xff] }
  0x98   :  { %v2578_v47 = vcombine.high %v160_v42, %v176_v43  ;;  %v209_v35 = vld [vmem:[#allocation5 + $0x4d0] sm:$0xff] }
  0x9a   :  { %2014 = vmatpush1.bf16.msra.mxu0 %v2571_v50  ;;  %2055 = vmatpush1.bf16.msra.mxu1 %v2573_v51  ;;  %v128_v50 = vld [vmem:[#allocation5 + $0x248] sm:$0xff] }
  0x9b   :  { %2015 = vmatprep.subr.bf16.mxu0 %v2540_v52  ;;  %2056 = vmatprep.subr.bf16.mxu1 %v2542_v53  ;;  %v144_v51 = vld [vmem:[#allocation5 + $0x2c8] sm:$0xff]  ;;  %v2575_v52 = vcombine.low %v159_v40, %v175_v41  ;;  %v2577_v53 = vcombine.low %v160_v42, %v176_v43  ;;  %v2612_v40 = vcombine.high %v193_v34, %v209_v35  ;;  %v161_v42 = vld [vmem:[#allocation5 + $0x350] sm:$0xff] }
  0x9c   :  { %v2546_v55 = vcombine.high %v128_v50, %v144_v51  ;;  %v177_v43 = vld [vmem:[#allocation5 + $0x3d0] sm:$0xff] }
  0x9e   :  { %2016 = vmatpush1.bf16.msra.mxu0 %v2539_v58  ;;  %2057 = vmatpush1.bf16.msra.mxu1 %v2541_v59  ;;  %v96_v58 = vld [vmem:[#allocation5 + $0x148] sm:$0xff] }
  0x9f   :  { %2017 = vmatprep.subr.bf16.mxu0 %v2508_v60  ;;  %2058 = vmatprep.subr.bf16.mxu1 %v2510_v61  ;;  %v112_v59 = vld [vmem:[#allocation5 + $0x1c8] sm:$0xff]  ;;  %v2543_v60 = vcombine.low %v127_v48, %v143_v49  ;;  %v2545_v61 = vcombine.low %v128_v50, %v144_v51  ;;  %v2580_v48 = vcombine.high %v161_v42, %v177_v43  ;;  %v129_v50 = vld [vmem:[#allocation5 + $0x250] sm:$0xff] }
  0xa0   :  { %v2514_v63 = vcombine.high %v96_v58, %v112_v59  ;;  %v145_v51 = vld [vmem:[#allocation5 + $0x2d0] sm:$0xff] }
  0xa2   :  { %2018 = vmatpush1.bf16.msra.mxu0 %v2507_v3  ;;  %2059 = vmatpush1.bf16.msra.mxu1 %v2509_v4  ;;  %v64_v3 = vld [vmem:[#allocation5 + $0x48] sm:$0xff] }
  0xa3   :  { %2019 = vmatprep.subr.bf16.mxu0 %v2476_v5  ;;  %2060 = vmatprep.subr.bf16.mxu1 %v2478_v6  ;;  %v80_v4 = vld [vmem:[#allocation5 + $0xc8] sm:$0xff]  ;;  %v2511_v5 = vcombine.low %v95_v56, %v111_v57  ;;  %v2513_v6 = vcombine.low %v96_v58, %v112_v59  ;;  %v2548_v56 = vcombine.high %v129_v50, %v145_v51  ;;  %v97_v58 = vld [vmem:[#allocation5 + $0x150] sm:$0xff] }
  0xa4   :  { %v2482_v8 = vcombine.high %v64_v3, %v80_v4  ;;  %v113_v59 = vld [vmem:[#allocation5 + $0x1d0] sm:$0xff] }
  0xa6   :  { %2020 = vmatpush1.bf16.msra.mxu0 %v2475_v12  ;;  %2061 = vmatpush1.bf16.msra.mxu1 %v2477_v13  ;;  %v290_v12 = vld [vmem:[#allocation5 + $0x758] sm:$0xff] }
  0xa7   :  { %2087 = vmatprep.subr.bf16.mxu0 %v2704_v14  ;;  %2128 = vmatprep.subr.bf16.mxu1 %v2706_v15  ;;  %v306_v13 = vld [vmem:[#allocation5 + $0x7d8] sm:$0xff]  ;;  %v2479_v14 = vcombine.low %v63_v1, %v79_v2  ;;  %v2481_v15 = vcombine.low %v64_v3, %v80_v4  ;;  %v2516_v1 = vcombine.high %v97_v58, %v113_v59  ;;  %v65_v3 = vld [vmem:[#allocation5 + $0x50] sm:$0xff] }
  0xa8   :  { %v2710_v17 = vcombine.high %v290_v12, %v306_v13  ;;  %v81_v4 = vld [vmem:[#allocation5 + $0xd0] sm:$0xff] }
  0xa9   :  { %2038 = vmatmul.mubr.bf16.vlgmr.msra.gmra.mxu0 %v2850_v11  ;;  %2079 = vmatmul.mubr.bf16.vlgmr.msra.gmra.mxu1 %v2850_v11 }
  0xaa   :  { %2088 = vmatpush1.bf16.msra.mxu0 %v2703_v20  ;;  %2129 = vmatpush1.bf16.msra.mxu1 %v2705_v21  ;;  %v258_v20 = vld [vmem:[#allocation5 + $0x658] sm:$0xff] }
  0xab   :  { %2089 = vmatprep.subr.bf16.mxu0 %v2672_v22  ;;  %2130 = vmatprep.subr.bf16.mxu1 %v2674_v23  ;;  %v274_v21 = vld [vmem:[#allocation5 + $0x6d8] sm:$0xff]  ;;  %v2707_v22 = vcombine.low %v289_v9, %v305_v10  ;;  %v2709_v23 = vcombine.low %v290_v12, %v306_v13  ;;  %v2484_v9 = vcombine.high %v65_v3, %v81_v4  ;;  %v291_v12 = vld [vmem:[#allocation5 + $0x760] sm:$0xff] }
  0xac   :  { %2119 = vmatprep.mubr.bf16.mxu0 %v2817_v0  ;;  %2160 = vmatprep.mubr.bf16.mxu1 %v2817_v0  ;;  %v2678_v25 = vcombine.high %v258_v20, %v274_v21  ;;  %v307_v13 = vld [vmem:[#allocation5 + $0x7e0] sm:$0xff] }
  0xae   :  { %2090 = vmatpush1.bf16.msra.mxu0 %v2671_v28  ;;  %2131 = vmatpush1.bf16.msra.mxu1 %v2673_v29  ;;  %v226_v28 = vld [vmem:[#allocation5 + $0x558] sm:$0xff] }
  0xaf   :  { %2091 = vmatprep.subr.bf16.mxu0 %v2640_v30  ;;  %2132 = vmatprep.subr.bf16.mxu1 %v2642_v31  ;;  %v242_v29 = vld [vmem:[#allocation5 + $0x5d8] sm:$0xff]  ;;  %v2675_v30 = vcombine.low %v257_v18, %v273_v19  ;;  %v2677_v31 = vcombine.low %v258_v20, %v274_v21  ;;  %v2712_v18 = vcombine.high %v291_v12, %v307_v13  ;;  %v259_v20 = vld [vmem:[#allocation5 + $0x660] sm:$0xff] }
  0xb0   :  { %v2646_v33 = vcombine.high %v226_v28, %v242_v29  ;;  %v275_v21 = vld [vmem:[#allocation5 + $0x6e0] sm:$0xff] }
  0xb2   :  { %2092 = vmatpush1.bf16.msra.mxu0 %v2639_v36  ;;  %2133 = vmatpush1.bf16.msra.mxu1 %v2641_v37  ;;  %v194_v36 = vld [vmem:[#allocation5 + $0x458] sm:$0xff] }
  0xb3   :  { %2093 = vmatprep.subr.bf16.mxu0 %v2608_v38  ;;  %2134 = vmatprep.subr.bf16.mxu1 %v2610_v39  ;;  %v210_v37 = vld [vmem:[#allocation5 + $0x4d8] sm:$0xff]  ;;  %v2643_v38 = vcombine.low %v225_v26, %v241_v27  ;;  %v2645_v39 = vcombine.low %v226_v28, %v242_v29  ;;  %v2680_v26 = vcombine.high %v259_v20, %v275_v21  ;;  %v227_v28 = vld [vmem:[#allocation5 + $0x560] sm:$0xff] }
  0xb4   :  { %v2614_v41 = vcombine.high %v194_v36, %v210_v37  ;;  %v243_v29 = vld [vmem:[#allocation5 + $0x5e0] sm:$0xff] }
  0xb6   :  { %2094 = vmatpush1.bf16.msra.mxu0 %v2607_v44  ;;  %2135 = vmatpush1.bf16.msra.mxu1 %v2609_v45  ;;  %v162_v44 = vld [vmem:[#allocation5 + $0x358] sm:$0xff] }
  0xb7   :  { %2095 = vmatprep.subr.bf16.mxu0 %v2576_v46  ;;  %2136 = vmatprep.subr.bf16.mxu1 %v2578_v47  ;;  %v178_v45 = vld [vmem:[#allocation5 + $0x3d8] sm:$0xff]  ;;  %v2611_v46 = vcombine.low %v193_v34, %v209_v35  ;;  %v2613_v47 = vcombine.low %v194_v36, %v210_v37  ;;  %v2648_v34 = vcombine.high %v227_v28, %v243_v29  ;;  %v195_v36 = vld [vmem:[#allocation5 + $0x460] sm:$0xff] }
  0xb8   :  { %v2582_v49 = vcombine.high %v162_v44, %v178_v45  ;;  %v211_v37 = vld [vmem:[#allocation5 + $0x4e0] sm:$0xff] }
  0xba   :  { %2096 = vmatpush1.bf16.msra.mxu0 %v2575_v52  ;;  %2137 = vmatpush1.bf16.msra.mxu1 %v2577_v53  ;;  %v130_v52 = vld [vmem:[#allocation5 + $0x258] sm:$0xff] }
  0xbb   :  { %2097 = vmatprep.subr.bf16.mxu0 %v2544_v54  ;;  %2138 = vmatprep.subr.bf16.mxu1 %v2546_v55  ;;  %v146_v53 = vld [vmem:[#allocation5 + $0x2d8] sm:$0xff]  ;;  %v2579_v54 = vcombine.low %v161_v42, %v177_v43  ;;  %v2581_v55 = vcombine.low %v162_v44, %v178_v45  ;;  %v2616_v42 = vcombine.high %v195_v36, %v211_v37  ;;  %v163_v44 = vld [vmem:[#allocation5 + $0x360] sm:$0xff] }
  0xbc   :  { %v2550_v57 = vcombine.high %v130_v52, %v146_v53  ;;  %v179_v45 = vld [vmem:[#allocation5 + $0x3e0] sm:$0xff] }
  0xbe   :  { %2098 = vmatpush1.bf16.msra.mxu0 %v2543_v60  ;;  %2139 = vmatpush1.bf16.msra.mxu1 %v2545_v61  ;;  %v98_v60 = vld [vmem:[#allocation5 + $0x158] sm:$0xff] }
  0xbf   :  { %2099 = vmatprep.subr.bf16.mxu0 %v2512_v62  ;;  %2140 = vmatprep.subr.bf16.mxu1 %v2514_v63  ;;  %v114_v61 = vld [vmem:[#allocation5 + $0x1d8] sm:$0xff]  ;;  %v2547_v62 = vcombine.low %v129_v50, %v145_v51  ;;  %v2549_v63 = vcombine.low %v130_v52, %v146_v53  ;;  %v2584_v50 = vcombine.high %v163_v44, %v179_v45  ;;  %v131_v52 = vld [vmem:[#allocation5 + $0x260] sm:$0xff] }
  0xc0   :  { %v2518_v2 = vcombine.high %v98_v60, %v114_v61  ;;  %v147_v53 = vld [vmem:[#allocation5 + $0x2e0] sm:$0xff] }
  0xc2   :  { %2100 = vmatpush1.bf16.msra.mxu0 %v2511_v5  ;;  %2141 = vmatpush1.bf16.msra.mxu1 %v2513_v6  ;;  %v66_v5 = vld [vmem:[#allocation5 + $0x58] sm:$0xff] }
  0xc3   :  { %2101 = vmatprep.subr.bf16.mxu0 %v2480_v7  ;;  %2142 = vmatprep.subr.bf16.mxu1 %v2482_v8  ;;  %v82_v6 = vld [vmem:[#allocation5 + $0xd8] sm:$0xff]  ;;  %v2515_v7 = vcombine.low %v97_v58, %v113_v59  ;;  %v2517_v8 = vcombine.low %v98_v60, %v114_v61  ;;  %v2552_v58 = vcombine.high %v131_v52, %v147_v53  ;;  %v99_v60 = vld [vmem:[#allocation5 + $0x160] sm:$0xff] }
  0xc4   :  { %v2486_v10 = vcombine.high %v66_v5, %v82_v6  ;;  %v115_v61 = vld [vmem:[#allocation5 + $0x1e0] sm:$0xff] }
  0xc6   :  { %2102 = vmatpush1.bf16.msra.mxu0 %v2479_v14  ;;  %2143 = vmatpush1.bf16.msra.mxu1 %v2481_v15  ;;  %v292_v14 = vld [vmem:[#allocation5 + $0x768] sm:$0xff] }
  0xc7   :  { %2169 = vmatprep.subr.bf16.mxu0 %v2708_v16  ;;  %2210 = vmatprep.subr.bf16.mxu1 %v2710_v17  ;;  %v308_v15 = vld [vmem:[#allocation5 + $0x7e8] sm:$0xff]  ;;  %v2483_v16 = vcombine.low %v65_v3, %v81_v4  ;;  %v2485_v17 = vcombine.low %v66_v5, %v82_v6  ;;  %v2520_v4 = vcombine.high %v99_v60, %v115_v61  ;;  %v67_v6 = vld [vmem:[#allocation5 + $0x60] sm:$0xff] }
  0xc8   :  { %v2714_v19 = vcombine.high %v292_v14, %v308_v15 }
  0xc9   :  { %2120 = vmatmul.mubr.bf16.vlgmr.msra.gmra.mxu0 %v2850_v11  ;;  %2161 = vmatmul.mubr.bf16.vlgmr.msra.gmra.mxu1 %v2850_v11 }
  0xca   :  { %2170 = vmatpush1.bf16.msra.mxu0 %v2707_v22  ;;  %2211 = vmatpush1.bf16.msra.mxu1 %v2709_v23  ;;  %v260_v22 = vld [vmem:[#allocation5 + $0x668] sm:$0xff] }
  0xcb   :  { %2171 = vmatprep.subr.bf16.mxu0 %v2676_v24  ;;  %2212 = vmatprep.subr.bf16.mxu1 %v2678_v25  ;;  %v276_v23 = vld [vmem:[#allocation5 + $0x6e8] sm:$0xff]  ;;  %v2711_v24 = vcombine.low %v291_v12, %v307_v13  ;;  %v2713_v25 = vcombine.low %v292_v14, %v308_v15 }
  0xcc   :  { %2201 = vmatprep.mubr.bf16.mxu0 %v2817_v0  ;;  %2242 = vmatprep.mubr.bf16.mxu1 %v2817_v0  ;;  %v2682_v27 = vcombine.high %v260_v22, %v276_v23 }
  0xce   :  { %2172 = vmatpush1.bf16.msra.mxu0 %v2675_v30  ;;  %2213 = vmatpush1.bf16.msra.mxu1 %v2677_v31  ;;  %v228_v30 = vld [vmem:[#allocation5 + $0x568] sm:$0xff] }
  0xcf   :  { %2173 = vmatprep.subr.bf16.mxu0 %v2644_v32  ;;  %2214 = vmatprep.subr.bf16.mxu1 %v2646_v33  ;;  %v244_v31 = vld [vmem:[#allocation5 + $0x5e8] sm:$0xff]  ;;  %v2679_v32 = vcombine.low %v259_v20, %v275_v21  ;;  %v2681_v33 = vcombine.low %v260_v22, %v276_v23  ;;  %v2881_v23 = vld [vmem:[#allocation7] sm:$0xff] }
  0xd0   :  { %v2650_v35 = vcombine.high %v228_v30, %v244_v31 }
  0xd2   :  { %2174 = vmatpush1.bf16.msra.mxu0 %v2643_v38  ;;  %2215 = vmatpush1.bf16.msra.mxu1 %v2645_v39  ;;  %v196_v38 = vld [vmem:[#allocation5 + $0x468] sm:$0xff] }
  0xd3   :  { %2175 = vmatprep.subr.bf16.mxu0 %v2612_v40  ;;  %2216 = vmatprep.subr.bf16.mxu1 %v2614_v41  ;;  %v212_v39 = vld [vmem:[#allocation5 + $0x4e8] sm:$0xff]  ;;  %v2647_v40 = vcombine.low %v227_v28, %v243_v29  ;;  %v2649_v41 = vcombine.low %v228_v30, %v244_v31  ;;  %v261_v28 = vld [vmem:[#allocation5 + $0x670] sm:$0xff]  ;;  %v262_v31 = vld [vmem:[#allocation5 + $0x678] sm:$0xff] }
  0xd4   :  { %v2618_v43 = vcombine.high %v196_v38, %v212_v39  ;;  %v277_v29 = vld [vmem:[#allocation5 + $0x6f0] sm:$0xff] }
  0xd6   :  { %2176 = vmatpush1.bf16.msra.mxu0 %v2611_v46  ;;  %2217 = vmatpush1.bf16.msra.mxu1 %v2613_v47  ;;  %v164_v46 = vld [vmem:[#allocation5 + $0x368] sm:$0xff] }
  0xd7   :  { %2177 = vmatprep.subr.bf16.mxu0 %v2580_v48  ;;  %2218 = vmatprep.subr.bf16.mxu1 %v2582_v49  ;;  %v180_v47 = vld [vmem:[#allocation5 + $0x3e8] sm:$0xff]  ;;  %v2615_v48 = vcombine.low %v195_v36, %v211_v37  ;;  %v2617_v49 = vcombine.low %v196_v38, %v212_v39  ;;  %v2684_v37 = vcombine.high %v261_v28, %v277_v29 }
  0xd8   :  { %v2586_v51 = vcombine.high %v164_v46, %v180_v47 }
  0xda   :  { %2178 = vmatpush1.bf16.msra.mxu0 %v2579_v54  ;;  %2219 = vmatpush1.bf16.msra.mxu1 %v2581_v55  ;;  %v132_v54 = vld [vmem:[#allocation5 + $0x268] sm:$0xff] }
  0xdb   :  { %2179 = vmatprep.subr.bf16.mxu0 %v2548_v56  ;;  %2220 = vmatprep.subr.bf16.mxu1 %v2550_v57  ;;  %v148_v55 = vld [vmem:[#allocation5 + $0x2e8] sm:$0xff]  ;;  %v2583_v56 = vcombine.low %v163_v44, %v179_v45  ;;  %v2585_v57 = vcombine.low %v164_v46, %v180_v47  ;;  %v230_v44 = vld [vmem:[#allocation5 + $0x578] sm:$0xff] }
  0xdc   :  { %v2554_v59 = vcombine.high %v132_v54, %v148_v55  ;;  %v2553_v3 = vcombine.low %v132_v54, %v148_v55  ;;  %v246_v45 = vld [vmem:[#allocation5 + $0x5f8] sm:$0xff] }
  0xdd   :  { %v2654_v55 = vcombine.high %v230_v44, %v246_v45 }
  0xde   :  { %2180 = vmatpush1.bf16.msra.mxu0 %v2547_v62  ;;  %2221 = vmatpush1.bf16.msra.mxu1 %v2549_v63  ;;  %v100_v62 = vld [vmem:[#allocation5 + $0x168] sm:$0xff] }
  0xdf   :  { %2181 = vmatprep.subr.bf16.mxu0 %v2516_v1  ;;  %2222 = vmatprep.subr.bf16.mxu1 %v2518_v2  ;;  %v116_v63 = vld [vmem:[#allocation5 + $0x1e8] sm:$0xff]  ;;  %v2551_v1 = vcombine.low %v131_v52, %v147_v53  ;;  %v319_v2 = vlaneseq }
  0xe0   :  { %v2522_v5 = vcombine.high %v100_v62, %v116_v63  ;;  %v2521_v13 = vcombine.low %v100_v62, %v116_v63 }
  0xe1   :  { %v2876_v12 = vshrl.u32 %v319_v2, 7  ;;  %v2653_v2 = vcombine.low %v230_v44, %v246_v45 }
  0xe2   :  { %2182 = vmatpush1.bf16.msra.mxu0 %v2515_v7  ;;  %2223 = vmatpush1.bf16.msra.mxu1 %v2517_v8  ;;  %v83_v7 = vld [vmem:[#allocation5 + $0xe0] sm:$0xff]  ;;  %v68_v8 = vld [vmem:[#allocation5 + $0x68] sm:$0xff] }
  0xe3   :  { %2183 = vmatprep.subr.bf16.mxu0 %v2484_v9  ;;  %2224 = vmatprep.subr.bf16.mxu1 %v2486_v10  ;;  %v84_v9 = vld [vmem:[#allocation5 + $0xe8] sm:$0xff]  ;;  %v2519_v10 = vcombine.low %v99_v60, %v115_v61  ;;  %v2488_v14 = vcombine.high %v67_v6, %v83_v7  ;;  %v2487_v20 = vcombine.low %v67_v6, %v83_v7  ;;  %v2879_v21 = vsub.s32 0, %v2876_v12  ;;  %v198_v60 = vld [vmem:[#allocation5 + $0x478] sm:$0xff]  ;;  %v165_v6 = vld [vmem:[#allocation5 + $0x370] sm:$0xff] }
  0xe4   :  { %v2490_v15 = vcombine.high %v68_v8, %v84_v9  ;;  %v2489_v22 = vcombine.low %v68_v8, %v84_v9  ;;  %v2890_v30 = vsub.s32 3, %v2876_v12  ;;  %v214_v61 = vld [vmem:[#allocation5 + $0x4f8] sm:$0xff]  ;;  %v181_v7 = vld [vmem:[#allocation5 + $0x3f0] sm:$0xff]  ;;  %v2905_v45 = vsub.s32 4, %v2876_v12 }
  0xe5   :  { %v166_v8 = vld [vmem:[#allocation5 + $0x378] sm:$0xff] }
  0xe6   :  { %2184 = vmatpush1.bf16.msra.mxu0 %v2483_v16  ;;  %2225 = vmatpush1.bf16.msra.mxu1 %v2485_v17  ;;  %v293_v16 = vld [vmem:[#allocation5 + $0x770] sm:$0xff]  ;;  %v182_v9 = vld [vmem:[#allocation5 + $0x3f8] sm:$0xff] }
  0xe7   :  { %2251 = vmatprep.subr.bf16.mxu0 %v2712_v18  ;;  %2292 = vmatprep.subr.bf16.mxu1 %v2714_v19  ;;  %v309_v17 = vld [vmem:[#allocation5 + $0x7f0] sm:$0xff]  ;;  %v294_v18 = vld [vmem:[#allocation5 + $0x778] sm:$0xff] }
  0xe8   :  { %v310_v19 = vld [vmem:[#allocation5 + $0x7f8] sm:$0xff] }
  0xe9   :  { %2202 = vmatmul.mubr.bf16.vlgmr.msra.gmra.mxu0 %v2850_v11  ;;  %2243 = vmatmul.mubr.bf16.vlgmr.msra.gmra.mxu1 %v2850_v11  ;;  %v2717_v36 = vcombine.low %v294_v18, %v310_v19 }
  0xea   :  { %2252 = vmatpush1.bf16.msra.mxu0 %v2711_v24  ;;  %2293 = vmatpush1.bf16.msra.mxu1 %v2713_v25  ;;  %v2884_v24 = vsub.s32 2, %v2876_v12  ;;  %v2716_v25 = vcombine.high %v293_v16, %v309_v17 }
  0xeb   :  { %2253 = vmatprep.subr.bf16.mxu0 %v2680_v26  ;;  %2294 = vmatprep.subr.bf16.mxu1 %v2682_v27  ;;  %v2718_v26 = vcombine.high %v294_v18, %v310_v19  ;;  %v2887_v27 = vsub.s32 1, %v2876_v12  ;;  %v150_v18 = vld [vmem:[#allocation5 + $0x2f8] sm:$0xff]  ;;  %v2587_v19 = vcombine.low %v165_v6, %v181_v7 }
  0xec   :  { %2283 = vmatprep.mubr.bf16.mxu0 %v2817_v0  ;;  %2324 = vmatprep.mubr.bf16.mxu1 %v2817_v0 }
  0xed   :  { %v326_v38 = vrot.slane %v2881_v23, %v2887_v27 }
  0xee   :  { %2254 = vmatpush1.bf16.msra.mxu0 %v2679_v32  ;;  %2295 = vmatpush1.bf16.msra.mxu1 %v2681_v33  ;;  %v278_v32 = vld [vmem:[#allocation5 + $0x6f8] sm:$0xff]  ;;  %v322_v33 = vrot.slane %v2881_v23, %v2879_v21 }
  0xef   :  { %2255 = vmatprep.subr.bf16.mxu0 %v2648_v34  ;;  %2296 = vmatprep.subr.bf16.mxu1 %v2650_v35  ;;  %v2715_v34 = vcombine.low %v293_v16, %v309_v17  ;;  %v330_v35 = vrot.slane %v2881_v23, %v2884_v24  ;;  %v2686_v39 = vcombine.high %v262_v31, %v278_v32  ;;  %v149_v16 = vld [vmem:[#allocation5 + $0x2f0] sm:$0xff]  ;;  %v134_v17 = vld [vmem:[#allocation5 + $0x278] sm:$0xff] }
  0xf2   :  { %2256 = vmatpush1.bf16.msra.mxu0 %v2647_v40  ;;  %2297 = vmatpush1.bf16.msra.mxu1 %v2649_v41  ;;  %v229_v40 = vld [vmem:[#allocation5 + $0x570] sm:$0xff] }
  0xf3   :  { %2257 = vmatprep.subr.bf16.mxu0 %v2616_v42  ;;  %2298 = vmatprep.subr.bf16.mxu1 %v2618_v43  ;;  %v245_v41 = vld [vmem:[#allocation5 + $0x5f0] sm:$0xff]  ;;  %v334_v43 = vrot.slane %v2881_v23, %v2890_v30 }
  0xf4   :  { %v2652_v52 = vcombine.high %v229_v40, %v245_v41  ;;  %v2651_v63 = vcombine.low %v229_v40, %v245_v41 }
  0xf6   :  { %2258 = vmatpush1.bf16.msra.mxu0 %v2615_v48  ;;  %2299 = vmatpush1.bf16.msra.mxu1 %v2617_v49  ;;  %v2683_v48 = vcombine.low %v261_v28, %v277_v29  ;;  %v117_v28 = vld [vmem:[#allocation5 + $0x1f0] sm:$0xff]  ;;  %v102_v29 = vld [vmem:[#allocation5 + $0x178] sm:$0xff] }
  0xf7   :  { %2259 = vmatprep.subr.bf16.mxu0 %v2584_v50  ;;  %2300 = vmatprep.subr.bf16.mxu1 %v2586_v51  ;;  %v2685_v51 = vcombine.low %v262_v31, %v278_v32  ;;  %v118_v31 = vld [vmem:[#allocation5 + $0x1f8] sm:$0xff] }
  0xf8   :  { %v2525_v41 = vcombine.low %v102_v29, %v118_v31 }
  0xfa   :  { %2260 = vmatpush1.bf16.msra.mxu0 %v2583_v56  ;;  %2301 = vmatpush1.bf16.msra.mxu1 %v2585_v57  ;;  %v197_v56 = vld [vmem:[#allocation5 + $0x470] sm:$0xff] }
  0xfb   :  { %2261 = vmatprep.subr.bf16.mxu0 %v2552_v58  ;;  %2302 = vmatprep.subr.bf16.mxu1 %v2554_v59  ;;  %v213_v57 = vld [vmem:[#allocation5 + $0x4f0] sm:$0xff] }
  0xfe   :  { %2262 = vmatpush1.bf16.msra.mxu0 %v2551_v1  ;;  %2303 = vmatpush1.bf16.msra.mxu1 %v2553_v3  ;;  %v2620_v3 = vcombine.high %v197_v56, %v213_v57 }
  0xff   :  { %2263 = vmatprep.subr.bf16.mxu0 %v2520_v4  ;;  %2304 = vmatprep.subr.bf16.mxu1 %v2522_v5  ;;  %v2622_v5 = vcombine.high %v198_v60, %v214_v61 }
 0x102   :  { %2264 = vmatpush1.bf16.msra.mxu0 %v2519_v10  ;;  %2305 = vmatpush1.bf16.msra.mxu1 %v2521_v13  ;;  %v2619_v10 = vcombine.low %v197_v56, %v213_v57  ;;  %v2588_v13 = vcombine.high %v165_v6, %v181_v7 }
 0x103   :  { %2265 = vmatprep.subr.bf16.mxu0 %v2488_v14  ;;  %2306 = vmatprep.subr.bf16.mxu1 %v2490_v15  ;;  %v2590_v14 = vcombine.high %v166_v8, %v182_v9  ;;  %v133_v15 = vld [vmem:[#allocation5 + $0x270] sm:$0xff] }
 0x104   :  { %v2555_v32 = vcombine.low %v133_v15, %v149_v16 }
 0x106   :  { %2266 = vmatpush1.bf16.msra.mxu0 %v2487_v20  ;;  %2307 = vmatpush1.bf16.msra.mxu1 %v2489_v22  ;;  %v2589_v20 = vcombine.low %v166_v8, %v182_v9  ;;  %v2556_v22 = vcombine.high %v133_v15, %v149_v16 }
 0x107   :  { %2333 = vmatprep.subr.bf16.mxu0 %v2716_v25  ;;  %2374 = vmatprep.subr.bf16.mxu1 %v2718_v26  ;;  %v2558_v25 = vcombine.high %v134_v17, %v150_v18  ;;  %v101_v26 = vld [vmem:[#allocation5 + $0x170] sm:$0xff] }
 0x108   :  { %v2523_v40 = vcombine.low %v101_v26, %v117_v28 }
 0x109   :  { %v1793_v42 = vpop.f32.mrf.mxu0  ;;  %2284 = vmatmul.mubr.bf16.vlgmr.msra.gmra.mxu0 %v2850_v11  ;;  %v1834_v47 = vpop.f32.mrf.mxu1  ;;  %2325 = vmatmul.mubr.bf16.vlgmr.msra.gmra.mxu1 %v2850_v11 }
 0x10a   :  { %v1794_v46 = vadd.f32 %v1793_v42, %v322_v33  ;;  %2334 = vmatpush1.bf16.msra.mxu0 %v2715_v34  ;;  %v1835_v49 = vadd.f32 %v1834_v47, %v330_v35  ;;  %2375 = vmatpush1.bf16.msra.mxu1 %v2717_v36  ;;  %v2557_v33 = vcombine.low %v134_v17, %v150_v18  ;;  %v69_v36 = vld [vmem:[#allocation5 + $0x70] sm:$0xff]  ;;  %v2908_v47 = vsub.s32 6, %v2876_v12 }
 0x10b   :  { %v1795_v50 = vpop.f32.mrf.mxu0  ;;  %2335 = vmatprep.subr.bf16.mxu0 %v2684_v37  ;;  %v1836_v54 = vpop.f32.mrf.mxu1  ;;  %2376 = vmatprep.subr.bf16.mxu1 %v2686_v39  ;;  %v2524_v34 = vcombine.high %v101_v26, %v117_v28  ;;  %v2526_v35 = vcombine.high %v102_v29, %v118_v31  ;;  %v85_v37 = vld [vmem:[#allocation5 + $0xf0] sm:$0xff]  ;;  %v86_v39 = vld [vmem:[#allocation5 + $0xf8] sm:$0xff] }
 0x10c   :  { %2415 = vst [vmem:[#allocation8] sm:$0xff] %v1794_v46  ;;  %v1796_v53 = vadd.f32 %v1795_v50, %v326_v38  ;;  %2365 = vmatprep.mubr.bf16.mxu0 %v2817_v0  ;;  %2417 = vst [vmem:[#allocation8 + $0x10] sm:$0xff] %v1835_v49  ;;  %v1837_v58 = vadd.f32 %v1836_v54, %v334_v43  ;;  %2406 = vmatprep.mubr.bf16.mxu1 %v2817_v0  ;;  %v70_v38 = vld [vmem:[#allocation5 + $0x78] sm:$0xff]  ;;  %v2914_v49 = vsub.s32 7, %v2876_v12 }
 0x10d   :  { %v1797_v59 = vpop.f32.mrf.mxu0  ;;  %v1838_v62 = vpop.f32.mrf.mxu1  ;;  %v2621_v0 = vcombine.low %v198_v60, %v214_v61  ;;  %v2492_v42 = vcombine.high %v69_v36, %v85_v37  ;;  %v2494_v43 = vcombine.high %v70_v38, %v86_v39  ;;  %v2491_v44 = vcombine.low %v69_v36, %v85_v37 }
 0x10e   :  { %2416 = vst [vmem:[#allocation8 + $0x8] sm:$0xff] %v1796_v53  ;;  %2336 = vmatpush1.bf16.msra.mxu0 %v2683_v48  ;;  %2418 = vst [vmem:[#allocation8 + $0x18] sm:$0xff] %v1837_v58  ;;  %2377 = vmatpush1.bf16.msra.mxu1 %v2685_v51  ;;  %v2493_v46 = vcombine.low %v70_v38, %v86_v39  ;;  %v2911_v48 = vsub.s32 5, %v2876_v12  ;;  %v338_v50 = vrot.slane %v2881_v23, %v2905_v45  ;;  %v313_v39 = vld [vmem:[#allocation7 + $0x10] sm:$0xff] }
 0x10f   :  { %v1798_v1 = vpop.f32.mrf.mxu0  ;;  %2337 = vmatprep.subr.bf16.mxu0 %v2652_v52  ;;  %v1839_v4 = vpop.f32.mrf.mxu1  ;;  %2378 = vmatprep.subr.bf16.mxu1 %v2654_v55  ;;  %v346_v51 = vrot.slane %v2881_v23, %v2908_v47  ;;  %v350_v54 = vrot.slane %v2881_v23, %v2914_v49 }
 0x110   :  { %v342_v52 = vrot.slane %v2881_v23, %v2911_v48 }
 0x112   :  { %2338 = vmatpush1.bf16.msra.mxu0 %v2651_v63  ;;  %2379 = vmatpush1.bf16.msra.mxu1 %v2653_v2  ;;  %v312_v2 = vld [vmem:[#allocation7 + $0x8] sm:$0xff] }
 0x113   :  { %2339 = vmatprep.subr.bf16.mxu0 %v2620_v3  ;;  %2380 = vmatprep.subr.bf16.mxu1 %v2622_v5  ;;  %v354_v23 = vrot.slane %v312_v2, %v2879_v21  ;;  %v362_v3 = vrot.slane %v312_v2, %v2884_v24  ;;  %v366_v5 = vrot.slane %v312_v2, %v2890_v30 }
 0x114   :  { %v370_v18 = vrot.slane %v312_v2, %v2905_v45 }
 0x116   :  { %2340 = vmatpush1.bf16.msra.mxu0 %v2619_v10  ;;  %2381 = vmatpush1.bf16.msra.mxu1 %v2621_v0 }
 0x117   :  { %2341 = vmatprep.subr.bf16.mxu0 %v2588_v13  ;;  %2382 = vmatprep.subr.bf16.mxu1 %v2590_v14 }
 0x11a   :  { %2342 = vmatpush1.bf16.msra.mxu0 %v2587_v19  ;;  %2383 = vmatpush1.bf16.msra.mxu1 %v2589_v20  ;;  %v378_v19 = vrot.slane %v312_v2, %v2908_v47  ;;  %v374_v20 = vrot.slane %v312_v2, %v2911_v48 }
 0x11b   :  { %2343 = vmatprep.subr.bf16.mxu0 %v2556_v22  ;;  %2384 = vmatprep.subr.bf16.mxu1 %v2558_v25  ;;  %v382_v25 = vrot.slane %v312_v2, %v2914_v49 }
 0x11e   :  { %2344 = vmatpush1.bf16.msra.mxu0 %v2555_v32  ;;  %2385 = vmatpush1.bf16.msra.mxu1 %v2557_v33 }
 0x11f   :  { %2345 = vmatprep.subr.bf16.mxu0 %v2524_v34  ;;  %2386 = vmatprep.subr.bf16.mxu1 %v2526_v35 }
 0x122   :  { %2346 = vmatpush1.bf16.msra.mxu0 %v2523_v40  ;;  %2387 = vmatpush1.bf16.msra.mxu1 %v2525_v41  ;;  %v386_v40 = vrot.slane %v313_v39, %v2879_v21  ;;  %v394_v41 = vrot.slane %v313_v39, %v2884_v24 }
 0x123   :  { %2347 = vmatprep.subr.bf16.mxu0 %v2492_v42  ;;  %2388 = vmatprep.subr.bf16.mxu1 %v2494_v43  ;;  %v390_v42 = vrot.slane %v313_v39, %v2887_v27 }
 0x126   :  { %2348 = vmatpush1.bf16.msra.mxu0 %v2491_v44  ;;  %2389 = vmatpush1.bf16.msra.mxu1 %v2493_v46  ;;  %v398_v44 = vrot.slane %v313_v39, %v2890_v30 }
 0x129   :  { %v1875_v53 = vpop.f32.mrf.mxu0  ;;  %2366 = vmatmul.mubr.bf16.vlgmr.msra.gmra.mxu0 %v2850_v11  ;;  %v1916_v12 = vpop.f32.mrf.mxu1  ;;  %2407 = vmatmul.mubr.bf16.vlgmr.msra.gmra.mxu1 %v2850_v11  ;;  %v358_v11 = vrot.slane %v312_v2, %v2887_v27 }
 0x12a   :  { %v1876_v55 = vadd.f32 %v1875_v53, %v338_v50  ;;  %v1917_v56 = vadd.f32 %v1916_v12, %v346_v51 }
 0x12b   :  { %v1877_v57 = vpop.f32.mrf.mxu0  ;;  %v1918_v59 = vpop.f32.mrf.mxu1 }
 0x12c   :  { %2419 = vst [vmem:[#allocation8 + $0x20] sm:$0xff] %v1876_v55  ;;  %v1878_v58 = vadd.f32 %v1877_v57, %v342_v52  ;;  %2421 = vst [vmem:[#allocation8 + $0x30] sm:$0xff] %v1917_v56  ;;  %v1919_v60 = vadd.f32 %v1918_v59, %v350_v54  ;;  %v402_v59 = vrot.slane %v313_v39, %v2905_v45 }
 0x12d   :  { %v1879_v61 = vpop.f32.mrf.mxu0  ;;  %v1920_v62 = vpop.f32.mrf.mxu1 }
 0x12e   :  { %2420 = vst [vmem:[#allocation8 + $0x28] sm:$0xff] %v1878_v58  ;;  %2422 = vst [vmem:[#allocation8 + $0x38] sm:$0xff] %v1919_v60  ;;  %v410_v60 = vrot.slane %v313_v39, %v2908_v47  ;;  %v406_v61 = vrot.slane %v313_v39, %v2911_v48 }
 0x12f   :  { %v1880_v63 = vpop.f32.mrf.mxu0  ;;  %v1921_v1 = vpop.f32.mrf.mxu1 }
 0x130   :  { %v414_v63 = vrot.slane %v313_v39, %v2914_v49 }
 0x149   :  { %v1957_v4 = vpop.f32.mrf.mxu0  ;;  %v1998_v7 = vpop.f32.mrf.mxu1 }
 0x14a   :  { %v1958_v6 = vadd.f32 %v1957_v4, %v354_v23  ;;  %v1999_v8 = vadd.f32 %v1998_v7, %v362_v3 }
 0x14b   :  { %v1959_v9 = vpop.f32.mrf.mxu0  ;;  %v2000_v0 = vpop.f32.mrf.mxu1 }
 0x14c   :  { %2423 = vst [vmem:[#allocation8 + $0x40] sm:$0xff] %v1958_v6  ;;  %v1960_v10 = vadd.f32 %v1959_v9, %v358_v11  ;;  %2425 = vst [vmem:[#allocation8 + $0x50] sm:$0xff] %v1999_v8  ;;  %v2001_v13 = vadd.f32 %v2000_v0, %v366_v5 }
 0x14d   :  { %v1961_v14 = vpop.f32.mrf.mxu0  ;;  %v2002_v15 = vpop.f32.mrf.mxu1 }
 0x14e   :  { %2424 = vst [vmem:[#allocation8 + $0x48] sm:$0xff] %v1960_v10  ;;  %2426 = vst [vmem:[#allocation8 + $0x58] sm:$0xff] %v2001_v13  ;;  %v314_v10 = vld [vmem:[#allocation7 + $0x18] sm:$0xff] }
 0x14f   :  { %v1962_v16 = vpop.f32.mrf.mxu0  ;;  %v2003_v17 = vpop.f32.mrf.mxu1  ;;  %v418_v0 = vrot.slane %v314_v10, %v2879_v21  ;;  %v426_v13 = vrot.slane %v314_v10, %v2884_v24  ;;  %v422_v14 = vrot.slane %v314_v10, %v2887_v27  ;;  %v434_v27 = vrot.slane %v314_v10, %v2905_v45 }
 0x150   :  { %v430_v16 = vrot.slane %v314_v10, %v2890_v30  ;;  %v438_v30 = vrot.slane %v314_v10, %v2911_v48 }
 0x169   :  { %v2039_v22 = vpop.f32.mrf.mxu0  ;;  %v2080_v28 = vpop.f32.mrf.mxu1 }
 0x16a   :  { %v2040_v26 = vadd.f32 %v2039_v22, %v370_v18  ;;  %v2081_v29 = vadd.f32 %v2080_v28, %v378_v19 }
 0x16b   :  { %v2041_v31 = vpop.f32.mrf.mxu0  ;;  %v2082_v33 = vpop.f32.mrf.mxu1 }
 0x16c   :  { %2427 = vst [vmem:[#allocation8 + $0x60] sm:$0xff] %v2040_v26  ;;  %v2042_v32 = vadd.f32 %v2041_v31, %v374_v20  ;;  %2429 = vst [vmem:[#allocation8 + $0x70] sm:$0xff] %v2081_v29  ;;  %v2083_v34 = vadd.f32 %v2082_v33, %v382_v25  ;;  %v442_v31 = vrot.slane %v314_v10, %v2908_v47 }
 0x16d   :  { %v2043_v35 = vpop.f32.mrf.mxu0  ;;  %v2084_v36 = vpop.f32.mrf.mxu1  ;;  %v446_v33 = vrot.slane %v314_v10, %v2914_v49 }
 0x16e   :  { %2428 = vst [vmem:[#allocation8 + $0x68] sm:$0xff] %v2042_v32  ;;  %2430 = vst [vmem:[#allocation8 + $0x78] sm:$0xff] %v2083_v34 }
 0x16f   :  { %v2044_v37 = vpop.f32.mrf.mxu0  ;;  %v2085_v38 = vpop.f32.mrf.mxu1 }
 0x189   :  { %v2121_v43 = vpop.f32.mrf.mxu0  ;;  %v2162_v50 = vpop.f32.mrf.mxu1 }
 0x18a   :  { %v2122_v46 = vadd.f32 %v2121_v43, %v386_v40  ;;  %v2163_v51 = vadd.f32 %v2162_v50, %v394_v41 }
 0x18b   :  { %v2123_v52 = vpop.f32.mrf.mxu0  ;;  %v2164_v54 = vpop.f32.mrf.mxu1 }
 0x18c   :  { %2431 = vst [vmem:[#allocation8 + $0x80] sm:$0xff] %v2122_v46  ;;  %v2124_v53 = vadd.f32 %v2123_v52, %v390_v42  ;;  %2433 = vst [vmem:[#allocation8 + $0x90] sm:$0xff] %v2163_v51  ;;  %v2165_v55 = vadd.f32 %v2164_v54, %v398_v44 }
 0x18d   :  { %v2125_v12 = vpop.f32.mrf.mxu0  ;;  %v2166_v56 = vpop.f32.mrf.mxu1 }
 0x18e   :  { %2432 = vst [vmem:[#allocation8 + $0x88] sm:$0xff] %v2124_v53  ;;  %2434 = vst [vmem:[#allocation8 + $0x98] sm:$0xff] %v2165_v55 }
 0x18f   :  { %v2126_v57 = vpop.f32.mrf.mxu0  ;;  %v2167_v58 = vpop.f32.mrf.mxu1 }
 0x1a9   :  { %v2203_v62 = vpop.f32.mrf.mxu0  ;;  %v2244_v2 = vpop.f32.mrf.mxu1 }
 0x1aa   :  { %v2204_v1 = vadd.f32 %v2203_v62, %v402_v59  ;;  %v2245_v23 = vadd.f32 %v2244_v2, %v410_v60 }
 0x1ab   :  { %v2205_v3 = vpop.f32.mrf.mxu0  ;;  %v2246_v4 = vpop.f32.mrf.mxu1 }
 0x1ac   :  { %2435 = vst [vmem:[#allocation8 + $0xa0] sm:$0xff] %v2204_v1  ;;  %v2206_v11 = vadd.f32 %v2205_v3, %v406_v61  ;;  %2437 = vst [vmem:[#allocation8 + $0xb0] sm:$0xff] %v2245_v23  ;;  %v2247_v5 = vadd.f32 %v2246_v4, %v414_v63 }
 0x1ad   :  { %v2207_v6 = vpop.f32.mrf.mxu0  ;;  %v2248_v7 = vpop.f32.mrf.mxu1 }
 0x1ae   :  { %2436 = vst [vmem:[#allocation8 + $0xa8] sm:$0xff] %v2206_v11  ;;  %2438 = vst [vmem:[#allocation8 + $0xb8] sm:$0xff] %v2247_v5 }
 0x1af   :  { %v2208_v8 = vpop.f32.mrf.mxu0  ;;  %v2249_v9 = vpop.f32.mrf.mxu1 }
 0x1c9   :  { %v2285_v15 = vpop.f32.mrf.mxu0  ;;  %v2326_v18 = vpop.f32.mrf.mxu1 }
 0x1ca   :  { %v2286_v17 = vadd.f32 %v2285_v15, %v418_v0  ;;  %v2327_v19 = vadd.f32 %v2326_v18, %v426_v13 }
 0x1cb   :  { %v2287_v20 = vpop.f32.mrf.mxu0  ;;  %v2328_v25 = vpop.f32.mrf.mxu1 }
 0x1cc   :  { %2439 = vst [vmem:[#allocation8 + $0xc0] sm:$0xff] %v2286_v17  ;;  %v2288_v22 = vadd.f32 %v2287_v20, %v422_v14  ;;  %2441 = vst [vmem:[#allocation8 + $0xd0] sm:$0xff] %v2327_v19  ;;  %v2329_v26 = vadd.f32 %v2328_v25, %v430_v16 }
 0x1cd   :  { %v2289_v28 = vpop.f32.mrf.mxu0  ;;  %v2330_v29 = vpop.f32.mrf.mxu1 }
 0x1ce   :  { %2440 = vst [vmem:[#allocation8 + $0xc8] sm:$0xff] %v2288_v22  ;;  %2442 = vst [vmem:[#allocation8 + $0xd8] sm:$0xff] %v2329_v26 }
 0x1cf   :  { %v2290_v21 = vpop.f32.mrf.mxu0  ;;  %v2331_v24 = vpop.f32.mrf.mxu1 }
 0x1e9   :  { %v2367_v32 = vpop.f32.mrf.mxu0  ;;  %v2408_v35 = vpop.f32.mrf.mxu1 }
 0x1ea   :  { %v2368_v34 = vadd.f32 %v2367_v32, %v434_v27  ;;  %v2409_v36 = vadd.f32 %v2408_v35, %v442_v31 }
 0x1eb   :  { %v2369_v37 = vpop.f32.mrf.mxu0  ;;  %v2410_v39 = vpop.f32.mrf.mxu1 }
 0x1ec   :  { %2443 = vst [vmem:[#allocation8 + $0xe0] sm:$0xff] %v2368_v34  ;;  %v2370_v38 = vadd.f32 %v2369_v37, %v438_v30  ;;  %2445 = vst [vmem:[#allocation8 + $0xf0] sm:$0xff] %v2409_v36  ;;  %v2411_v40 = vadd.f32 %v2410_v39, %v446_v33 }
 0x1ed   :  { %v2371_v41 = vpop.f32.mrf.mxu0  ;;  %v2412_v45 = vpop.f32.mrf.mxu1 }
 0x1ee   :  { %2444 = vst [vmem:[#allocation8 + $0xe8] sm:$0xff] %v2370_v38  ;;  %2446 = vst [vmem:[#allocation8 + $0xf8] sm:$0xff] %v2411_v40 }
 0x1ef   :  { %v2372_v47 = vpop.f32.mrf.mxu0  ;;  %v2413_v48 = vpop.f32.mrf.mxu1 }
 0x1f0   :  { %2797 = shalt.err (!%p2794_p5)
}
 0x1f1   :  { %2456 = dma.vmem_to_hbm [thread:$0]  %s2454_s2, 4096, %s2956_s3, [#allocation4]  }
 0x1f2   :  { %2810 = dma.done.wait [#allocation4], 4096  }
 0x1f3   :  { %2811 = vsyncadd [#allocation4], 4294963200 }
 0x1f4   :  { %2460 = vsyncpa [#allocation3], 1 }
 0x1f5   :  { %2461 = vsyncpa [#allocation6], 1 }
 0x1f6   :  { %2462 = vsyncpa [#allocation4], 1 }

</bundles_post_ra>
